<compile_context>
chip_gen: v5e
topology: v5e:2x2
jax: 0.10.0
libtpu: 0.0.40
codegen_flags: <defaults>
</compile_context>

<pallas_src>
import functools
import math

import jax
import jax.numpy as jnp
import numpy as np
from jax import lax
from jax.experimental import pallas as pl
from jax.experimental.pallas import tpu as pltpu

IMAGE_CHANNELS = 3
IMAGE_SIZE = 32
EPS = 1e-5


# ----------------------------------------------------------------------------
# Fused kernel: rows = (sample, h, w) on the low-res grid,
# columns = (quadrant i, quadrant j, channel).
# ----------------------------------------------------------------------------
def _dec_block_kernel(xpad_ref, w1_ref, w2_ref, m1_ref, g1_ref, b1_ref,
                      g2_ref, b2_ref, wl_ref, bl_ref,
                      y_ref, img_ref, apad_ref,
                      *, B, H, W, Cin, Cout, dot_dtype):
    f32 = jnp.float32
    HW = H * W
    C4 = 4 * Cout
    M = B * HW

    # ---- conv1 (3x3, bias=False) fused with PixelShuffle(2): 9 tap matmuls
    acc1 = None
    for ky in range(3):
        for kx in range(3):
            tap = xpad_ref[:, ky:ky + H, kx:kx + W, :]          # (B,H,W,Cin)
            tap = tap.reshape(M, Cin).astype(dot_dtype)
            d = jnp.dot(tap, w1_ref[ky * 3 + kx],
                        preferred_element_type=f32)             # (M, 4*Cout)
            acc1 = d if acc1 is None else acc1 + d

    # ---- GroupNorm (16-channel groups over all quadrants+spatial) + ReLU,
    #      two-pass variance for robustness; 1/count folded into m1 ----
    def group_norm_relu(acc, gamma, beta):
        a3 = acc.reshape(B, HW, C4)
        mean = jnp.dot(jnp.sum(a3, axis=1), m1_ref[...],
                       preferred_element_type=f32)              # (B, C4)
        xc = a3 - mean[:, None, :]
        var = jnp.dot(jnp.sum(xc * xc, axis=1), m1_ref[...],
                      preferred_element_type=f32)               # (B, C4)
        inv = lax.rsqrt(var + EPS)
        scale = gamma * inv                                     # (B, C4)
        shift = beta - mean * scale
        return jnp.maximum(a3 * scale[:, None, :] + shift[:, None, :], 0.0)

    a = group_norm_relu(acc1, g1_ref[...], b1_ref[...])         # (B, HW, C4)

    # ---- stash activation into a zero-padded VMEM window for conv2 taps ----
    apad_ref[...] = jnp.zeros_like(apad_ref)
    apad_ref[:, 1:H + 1, 1:W + 1, :] = (
        a.reshape(B, H, W, C4).astype(apad_ref.dtype))

    # ---- conv2 (3x3 on the 2Hx2W pixel-shuffled grid), quadrant-decomposed:
    #      9 low-res shifts x (4Cout,4Cout) precomputed shift weights ----
    acc2 = None
    for si in range(3):            # low-res row shift  sh = si - 1
        for sj in range(3):        # low-res col shift  sw = sj - 1
            win = apad_ref[:, si:si + H, sj:sj + W, :]          # (B,H,W,C4)
            win = win.reshape(M, C4)
            d = jnp.dot(win, w2_ref[si * 3 + sj],
                        preferred_element_type=f32)
            acc2 = d if acc2 is None else acc2 + d

    y = group_norm_relu(acc2, g2_ref[...], b2_ref[...])         # (B, HW, C4)
    y_ref[...] = y.astype(y_ref.dtype)

    # ---- 1x1 last_conv (with bias), block-diagonal over quadrants ----
    img = (jnp.dot(y.reshape(M, C4), wl_ref[...],
                   preferred_element_type=f32) + bl_ref[...])
    img_ref[...] = img.reshape(B, HW, img.shape[-1]).astype(img_ref.dtype)


# ----------------------------------------------------------------------------
# Static helpers (pure Python / numpy constants, no device data)
# ----------------------------------------------------------------------------
def _conv2_shift_selector():
    """sel[s, p, q, ky, kx] = 1 iff conv2 tap (ky-1, kx-1) at output quadrant
    q reads input quadrant p shifted by the low-res offset encoded by
    s = (sh+1)*3 + (sw+1), sh/sw in {-1, 0, +1}."""
    sel = np.zeros((9, 4, 4, 3, 3), np.float32)

    def split(t):                      # full-res index 2h+t -> (sub, shift)
        return t % 2, (t - t % 2) // 2

    for i in (0, 1):
        for j in (0, 1):
            for dy in (-1, 0, 1):
                for dx in (-1, 0, 1):
                    ii, sh = split(i + dy)
                    jj, sw = split(j + dx)
                    s = (sh + 1) * 3 + (sw + 1)
                    sel[s, ii * 2 + jj, i * 2 + j, dy + 1, dx + 1] = 1.0
    return sel


_CONV2_SEL = _conv2_shift_selector()


def _pick_batch_block(n, rows_per_sample, target_rows=256, min_grid=2):
    """Largest divisor of n with ~target_rows matmul rows per step, while
    keeping the grid length >= min_grid (so multi-TC chips stay busy)."""
    cap = max(1, target_rows // rows_per_sample)
    if n >= min_grid:
        cap = min(cap, n // min_grid)
    best = 1
    for d in range(1, n + 1):
        if n % d == 0 and d <= cap:
            best = d
    return best


# ----------------------------------------------------------------------------
# Wrapper
# ----------------------------------------------------------------------------
def dec_block_forward(x_nchw, params, *, conv_dtype=jnp.float32):
    """Pallas implementation of DecBlock.forward.  x_nchw: (N, Cin, H, W)."""
    N, Cin, H, W = x_nchw.shape
    Cout = params["g1"].shape[-1]
    C_IMG = 2 * IMAGE_CHANNELS
    HW, C4, CI4 = H * W, 4 * Cout, 4 * C_IMG
    f32 = jnp.float32

    # -------- input layout glue (the only pre-kernel XLA ops) --------
    x_nhwc = jnp.transpose(x_nchw, (0, 2, 3, 1))
    xpad = jnp.pad(x_nhwc, ((0, 0), (1, 1), (1, 1), (0, 0))).astype(conv_dtype)

    # conv1 weights per tap: (9, Cin, 4*Cout), columns ordered (i, j, cout)
    w1taps = jnp.transpose(params["w1"], (2, 3, 4, 0, 1, 5)).reshape(
        9, Cin, C4).astype(conv_dtype)
    # conv2 quadrant-decomposed shift weights: (9, 4*Cout, 4*Cout)
    w2big = jnp.einsum("spqyx,yxio->spiqo", _CONV2_SEL,
                       params["w2"]).reshape(9, C4, C4).astype(conv_dtype)
    # group-reduce mask with 1/count folded (count = 16 chan * (2H * 2W))
    gidx = np.tile(np.arange(Cout) // 16, 4)
    m1 = jnp.asarray((gidx[:, None] == gidx[None, :]).astype(np.float32)
                     / float(16 * 4 * HW))
    g1t = jnp.tile(params["g1"].reshape(1, Cout), (1, 4)).astype(f32)
    b1t = jnp.tile(params["b1"].reshape(1, Cout), (1, 4)).astype(f32)
    g2t = jnp.tile(params["g2"].reshape(1, Cout), (1, 4)).astype(f32)
    b2t = jnp.tile(params["b2"].reshape(1, Cout), (1, 4)).astype(f32)
    # 1x1 last conv, replicated per quadrant (block diagonal) + tiled bias
    wl_big = jnp.kron(jnp.eye(4, dtype=f32), params["wl"].astype(f32))
    bl_big = jnp.tile(params["bl"].reshape(1, C_IMG), (1, 4)).astype(f32)

    B = _pick_batch_block(N, HW)
    kern = functools.partial(_dec_block_kernel, B=B, H=H, W=W, Cin=Cin,
                             Cout=Cout, dot_dtype=conv_dtype)

    def const(shape):
        return pl.BlockSpec(shape, lambda n, _s=len(shape): (0,) * _s)

    y_q, img_q = pl.pallas_call(
        kern,
        grid=(N // B,),
        in_specs=[
            pl.BlockSpec((B, H + 2, W + 2, Cin), lambda n: (n, 0, 0, 0)),
            const((9, Cin, C4)),
            const((9, C4, C4)),
            const((C4, C4)),
            const((1, C4)), const((1, C4)),
            const((1, C4)), const((1, C4)),
            const((C4, CI4)),
            const((1, CI4)),
        ],
        out_specs=(
            pl.BlockSpec((B, HW, C4), lambda n: (n, 0, 0)),
            pl.BlockSpec((B, HW, CI4), lambda n: (n, 0, 0)),
        ),
        out_shape=(
            jax.ShapeDtypeStruct((N, HW, C4), f32),
            jax.ShapeDtypeStruct((N, HW, CI4), f32),
        ),
        scratch_shapes=[pltpu.VMEM((B, H + 2, W + 2, C4), conv_dtype)],
        compiler_params=pltpu.CompilerParams(
            dimension_semantics=("parallel",)),
    )(xpad, w1taps, w2big, m1, g1t, b1t, g2t, b2t, wl_big, bl_big)

    # -------- output layout glue: quadrant layout -> NCHW full resolution ----
    y = (y_q.reshape(N, H, W, 2, 2, Cout)
         .transpose(0, 5, 1, 3, 2, 4).reshape(N, Cout, 2 * H, 2 * W))
    img_small = (img_q.reshape(N, H, W, 2, 2, C_IMG)
                 .transpose(0, 5, 1, 3, 2, 4).reshape(N, C_IMG, 2 * H, 2 * W))

    # F.interpolate(..., size=(32, 32), mode='nearest') as a pure index gather
    ridx = (jnp.arange(IMAGE_SIZE) * (2 * H)) // IMAGE_SIZE
    cidx = (jnp.arange(IMAGE_SIZE) * (2 * W)) // IMAGE_SIZE
    img = img_small[:, :, ridx, :][:, :, :, cidx]
    return y, img


# ----------------------------------------------------------------------------
# Plain-JAX reference (mirrors the PyTorch forward), for verification
# ----------------------------------------------------------------------------
def dec_block_reference(x, params):
    N, Cin, H, W = x.shape
    Cout = params["g1"].shape[-1]
    C_IMG = 2 * IMAGE_CHANNELS

    w1_t = jnp.transpose(params["w1"], (5, 0, 1, 4, 2, 3)).reshape(
        4 * Cout, Cin, 3, 3)
    w2_t = jnp.transpose(params["w2"], (3, 2, 0, 1))
    wl_t = jnp.transpose(params["wl"], (1, 0)).reshape(C_IMG, Cout, 1, 1)

    dn = ("NCHW", "OIHW", "NCHW")

    def conv(a, w, p):
        return lax.conv_general_dilated(a, w, (1, 1), ((p, p), (p, p)),
                                        dimension_numbers=dn,
                                        precision=lax.Precision.HIGHEST)

    def gn_relu(t, gamma, beta):
        n, c, h, w = t.shape
        g = c // 16
        tg = t.reshape(n, g, -1)
        m = tg.mean(-1, keepdims=True)
        v = ((tg - m) ** 2).mean(-1, keepdims=True)
        tn = ((tg - m) * lax.rsqrt(v + EPS)).reshape(n, c, h, w)
        return jax.nn.relu(tn * gamma.reshape(1, c, 1, 1)
                           + beta.reshape(1, c, 1, 1))

    z = conv(x, w1_t, 1)
    z = z.reshape(N, Cout, 2, 2, H, W).transpose(0, 1, 4, 2, 5, 3).reshape(
        N, Cout, 2 * H, 2 * W)                                  # PixelShuffle
    a = gn_relu(z, params["g1"], params["b1"])
    b = conv(a, w2_t, 1)
    y = gn_relu(b, params["g2"], params["b2"])
    img_s = conv(y, wl_t, 0) + params["bl"].reshape(1, -1, 1, 1)
    ridx = (jnp.arange(IMAGE_SIZE) * (2 * H)) // IMAGE_SIZE
    cidx = (jnp.arange(IMAGE_SIZE) * (2 * W)) // IMAGE_SIZE
    img = img_s[:, :, ridx, :][:, :, :, cidx]
    return y, img


if __name__ == "__main__":
    N, Cin, Cout, H, W = 2, 16, 16, 8, 8          # Cout multiple of 16 (GN)
    C_IMG = 2 * IMAGE_CHANNELS

    key = jax.random.PRNGKey(0)
    ks = jax.random.split(key, 8)
    params = dict(
        # conv1 weights in per-quadrant layout (i, j, ky, kx, Cin, Cout)
        w1=jax.random.normal(ks[0], (2, 2, 3, 3, Cin, Cout), jnp.float32)
           * (1.0 / math.sqrt(9 * Cin)),
        g1=1.0 + 0.1 * jax.random.normal(ks[1], (1, Cout), jnp.float32),
        b1=0.1 * jax.random.normal(ks[2], (1, Cout), jnp.float32),
        # conv2 weights (ky, kx, Cin, Cout)
        w2=jax.random.normal(ks[3], (3, 3, Cout, Cout), jnp.float32)
           * (1.0 / math.sqrt(9 * Cout)),
        g2=1.0 + 0.1 * jax.random.normal(ks[4], (1, Cout), jnp.float32),
        b2=0.1 * jax.random.normal(ks[5], (1, Cout), jnp.float32),
        wl=jax.random.normal(ks[6], (Cout, C_IMG), jnp.float32)
           * (1.0 / math.sqrt(Cout)),
        bl=0.05 * jnp.arange(C_IMG, dtype=jnp.float32).reshape(1, C_IMG),
    )
    x = jax.random.normal(ks[7], (N, Cin, H, W), jnp.float32)

    # default conv_dtype=f32 keeps the 5e-3 tolerance with margin;
    # pass conv_dtype=jnp.bfloat16 on v6e/v7x to halve DMA bytes + MXU time.
    fwd = jax.jit(dec_block_forward)
    y, img = jax.block_until_ready(fwd(x, params))

    assert y.shape == (N, Cout, 2 * H, 2 * W)
    assert img.shape == (N, C_IMG, IMAGE_SIZE, IMAGE_SIZE)

    y_ref, img_ref = dec_block_reference(x, params)
    np.testing.assert_allclose(np.asarray(y), np.asarray(y_ref),
                               rtol=5e-3, atol=5e-3)
    np.testing.assert_allclose(np.asarray(img), np.asarray(img_ref),
                               rtol=5e-3, atol=5e-3)

    print("KERNEL_OK")
</pallas_src>

<mosaic_0001>
module attributes {stable_mosaic.version = 11 : i64} {
  func.func @_dec_block_kernel(%arg0: i32, %arg1: memref<1x10x10x16xf32, #tpu.memory_space<vmem>>, %arg2: memref<9x16x64xf32, #tpu.memory_space<vmem>>, %arg3: memref<9x64x64xf32, #tpu.memory_space<vmem>>, %arg4: memref<64x64xf32, #tpu.memory_space<vmem>>, %arg5: memref<1x64xf32, #tpu.memory_space<vmem>>, %arg6: memref<1x64xf32, #tpu.memory_space<vmem>>, %arg7: memref<1x64xf32, #tpu.memory_space<vmem>>, %arg8: memref<1x64xf32, #tpu.memory_space<vmem>>, %arg9: memref<64x24xf32, #tpu.memory_space<vmem>>, %arg10: memref<1x24xf32, #tpu.memory_space<vmem>>, %arg11: memref<1x64x64xf32, #tpu.memory_space<vmem>>, %arg12: memref<1x64x24xf32, #tpu.memory_space<vmem>>, %arg13: memref<1x10x10x64xf32, #tpu.memory_space<vmem>>) attributes {dimension_semantics = [#tpu.dimension_semantics<parallel>], iteration_bounds = array<i64: 2>, scalar_prefetch = 0 : i64, scratch_operands = 1 : i64, tpu.core_type = #tpu.core_type<tc>, window_params = [{transform_indices = @transform_0, window_bounds = array<i64: 1, 10, 10, 16>}, {pipeline_mode = #tpu.pipeline_mode<synchronous>, transform_indices = @transform_1, window_bounds = array<i64: 9, 16, 64>}, {pipeline_mode = #tpu.pipeline_mode<synchronous>, transform_indices = @transform_2, window_bounds = array<i64: 9, 64, 64>}, {pipeline_mode = #tpu.pipeline_mode<synchronous>, transform_indices = @transform_3, window_bounds = array<i64: 64, 64>}, {pipeline_mode = #tpu.pipeline_mode<synchronous>, transform_indices = @transform_4, window_bounds = array<i64: 1, 64>}, {pipeline_mode = #tpu.pipeline_mode<synchronous>, transform_indices = @transform_5, window_bounds = array<i64: 1, 64>}, {pipeline_mode = #tpu.pipeline_mode<synchronous>, transform_indices = @transform_6, window_bounds = array<i64: 1, 64>}, {pipeline_mode = #tpu.pipeline_mode<synchronous>, transform_indices = @transform_7, window_bounds = array<i64: 1, 64>}, {pipeline_mode = #tpu.pipeline_mode<synchronous>, transform_indices = @transform_8, window_bounds = array<i64: 64, 24>}, {pipeline_mode = #tpu.pipeline_mode<synchronous>, transform_indices = @transform_9, window_bounds = array<i64: 1, 24>}, {transform_indices = @transform_10, window_bounds = array<i64: 1, 64, 64>}, {transform_indices = @transform_11, window_bounds = array<i64: 1, 64, 24>}]} {
    %c0 = arith.constant 0 : index
    %c0_0 = arith.constant 0 : index
    %c0_1 = arith.constant 0 : index
    %c0_2 = arith.constant 0 : index
    %0 = vector.load %arg1[%c0, %c0_0, %c0_1, %c0_2] : memref<1x10x10x16xf32, #tpu.memory_space<vmem>>, vector<1x8x8x16xf32>
    %1 = vector.shape_cast %0 : vector<1x8x8x16xf32> to vector<64x16xf32>
    %c0_3 = arith.constant 0 : index
    %c0_4 = arith.constant 0 : index
    %c0_5 = arith.constant 0 : index
    %2 = vector.load %arg2[%c0_3, %c0_4, %c0_5] : memref<9x16x64xf32, #tpu.memory_space<vmem>>, vector<1x16x64xf32>
    %3 = vector.shape_cast %2 : vector<1x16x64xf32> to vector<16x64xf32>
    %cst = arith.constant dense<0.000000e+00> : vector<64x64xf32>
    %4 = tpu.matmul %1, %3, %cst {dimension_numbers = #tpu.dot_dimension_numbers<[1], [0], [0], [1], [0, 0, 1, 1], [], []>} : vector<64x16xf32>, vector<16x64xf32>, vector<64x64xf32> -> vector<64x64xf32>
    %c0_6 = arith.constant 0 : index
    %c0_7 = arith.constant 0 : index
    %c1 = arith.constant 1 : index
    %c0_8 = arith.constant 0 : index
    %5 = vector.load %arg1[%c0_6, %c0_7, %c1, %c0_8] : memref<1x10x10x16xf32, #tpu.memory_space<vmem>>, vector<1x8x8x16xf32>
    %6 = vector.shape_cast %5 : vector<1x8x8x16xf32> to vector<64x16xf32>
    %c1_9 = arith.constant 1 : index
    %c0_10 = arith.constant 0 : index
    %c0_11 = arith.constant 0 : index
    %7 = vector.load %arg2[%c1_9, %c0_10, %c0_11] : memref<9x16x64xf32, #tpu.memory_space<vmem>>, vector<1x16x64xf32>
    %8 = vector.shape_cast %7 : vector<1x16x64xf32> to vector<16x64xf32>
    %cst_12 = arith.constant dense<0.000000e+00> : vector<64x64xf32>
    %9 = tpu.matmul %6, %8, %cst_12 {dimension_numbers = #tpu.dot_dimension_numbers<[1], [0], [0], [1], [0, 0, 1, 1], [], []>} : vector<64x16xf32>, vector<16x64xf32>, vector<64x64xf32> -> vector<64x64xf32>
    %10 = arith.addf %4, %9 : vector<64x64xf32>
    %c0_13 = arith.constant 0 : index
    %c0_14 = arith.constant 0 : index
    %c2 = arith.constant 2 : index
    %c0_15 = arith.constant 0 : index
    %11 = vector.load %arg1[%c0_13, %c0_14, %c2, %c0_15] : memref<1x10x10x16xf32, #tpu.memory_space<vmem>>, vector<1x8x8x16xf32>
    %12 = vector.shape_cast %11 : vector<1x8x8x16xf32> to vector<64x16xf32>
    %c2_16 = arith.constant 2 : index
    %c0_17 = arith.constant 0 : index
    %c0_18 = arith.constant 0 : index
    %13 = vector.load %arg2[%c2_16, %c0_17, %c0_18] : memref<9x16x64xf32, #tpu.memory_space<vmem>>, vector<1x16x64xf32>
    %14 = vector.shape_cast %13 : vector<1x16x64xf32> to vector<16x64xf32>
    %cst_19 = arith.constant dense<0.000000e+00> : vector<64x64xf32>
    %15 = tpu.matmul %12, %14, %cst_19 {dimension_numbers = #tpu.dot_dimension_numbers<[1], [0], [0], [1], [0, 0, 1, 1], [], []>} : vector<64x16xf32>, vector<16x64xf32>, vector<64x64xf32> -> vector<64x64xf32>
    %16 = arith.addf %10, %15 : vector<64x64xf32>
    %c0_20 = arith.constant 0 : index
    %c1_21 = arith.constant 1 : index
    %c0_22 = arith.constant 0 : index
    %c0_23 = arith.constant 0 : index
    %17 = vector.load %arg1[%c0_20, %c1_21, %c0_22, %c0_23] : memref<1x10x10x16xf32, #tpu.memory_space<vmem>>, vector<1x8x8x16xf32>
    %18 = vector.shape_cast %17 : vector<1x8x8x16xf32> to vector<64x16xf32>
    %c3 = arith.constant 3 : index
    %c0_24 = arith.constant 0 : index
    %c0_25 = arith.constant 0 : index
    %19 = vector.load %arg2[%c3, %c0_24, %c0_25] : memref<9x16x64xf32, #tpu.memory_space<vmem>>, vector<1x16x64xf32>
    %20 = vector.shape_cast %19 : vector<1x16x64xf32> to vector<16x64xf32>
    %cst_26 = arith.constant dense<0.000000e+00> : vector<64x64xf32>
    %21 = tpu.matmul %18, %20, %cst_26 {dimension_numbers = #tpu.dot_dimension_numbers<[1], [0], [0], [1], [0, 0, 1, 1], [], []>} : vector<64x16xf32>, vector<16x64xf32>, vector<64x64xf32> -> vector<64x64xf32>
    %22 = arith.addf %16, %21 : vector<64x64xf32>
    %c0_27 = arith.constant 0 : index
    %c1_28 = arith.constant 1 : index
    %c1_29 = arith.constant 1 : index
    %c0_30 = arith.constant 0 : index
    %23 = vector.load %arg1[%c0_27, %c1_28, %c1_29, %c0_30] : memref<1x10x10x16xf32, #tpu.memory_space<vmem>>, vector<1x8x8x16xf32>
    %24 = vector.shape_cast %23 : vector<1x8x8x16xf32> to vector<64x16xf32>
    %c4 = arith.constant 4 : index
    %c0_31 = arith.constant 0 : index
    %c0_32 = arith.constant 0 : index
    %25 = vector.load %arg2[%c4, %c0_31, %c0_32] : memref<9x16x64xf32, #tpu.memory_space<vmem>>, vector<1x16x64xf32>
    %26 = vector.shape_cast %25 : vector<1x16x64xf32> to vector<16x64xf32>
    %cst_33 = arith.constant dense<0.000000e+00> : vector<64x64xf32>
    %27 = tpu.matmul %24, %26, %cst_33 {dimension_numbers = #tpu.dot_dimension_numbers<[1], [0], [0], [1], [0, 0, 1, 1], [], []>} : vector<64x16xf32>, vector<16x64xf32>, vector<64x64xf32> -> vector<64x64xf32>
    %28 = arith.addf %22, %27 : vector<64x64xf32>
    %c0_34 = arith.constant 0 : index
    %c1_35 = arith.constant 1 : index
    %c2_36 = arith.constant 2 : index
    %c0_37 = arith.constant 0 : index
    %29 = vector.load %arg1[%c0_34, %c1_35, %c2_36, %c0_37] : memref<1x10x10x16xf32, #tpu.memory_space<vmem>>, vector<1x8x8x16xf32>
    %30 = vector.shape_cast %29 : vector<1x8x8x16xf32> to vector<64x16xf32>
    %c5 = arith.constant 5 : index
    %c0_38 = arith.constant 0 : index
    %c0_39 = arith.constant 0 : index
    %31 = vector.load %arg2[%c5, %c0_38, %c0_39] : memref<9x16x64xf32, #tpu.memory_space<vmem>>, vector<1x16x64xf32>
    %32 = vector.shape_cast %31 : vector<1x16x64xf32> to vector<16x64xf32>
    %cst_40 = arith.constant dense<0.000000e+00> : vector<64x64xf32>
    %33 = tpu.matmul %30, %32, %cst_40 {dimension_numbers = #tpu.dot_dimension_numbers<[1], [0], [0], [1], [0, 0, 1, 1], [], []>} : vector<64x16xf32>, vector<16x64xf32>, vector<64x64xf32> -> vector<64x64xf32>
    %34 = arith.addf %28, %33 : vector<64x64xf32>
    %c0_41 = arith.constant 0 : index
    %c2_42 = arith.constant 2 : index
    %c0_43 = arith.constant 0 : index
    %c0_44 = arith.constant 0 : index
    %35 = vector.load %arg1[%c0_41, %c2_42, %c0_43, %c0_44] : memref<1x10x10x16xf32, #tpu.memory_space<vmem>>, vector<1x8x8x16xf32>
    %36 = vector.shape_cast %35 : vector<1x8x8x16xf32> to vector<64x16xf32>
    %c6 = arith.constant 6 : index
    %c0_45 = arith.constant 0 : index
    %c0_46 = arith.constant 0 : index
    %37 = vector.load %arg2[%c6, %c0_45, %c0_46] : memref<9x16x64xf32, #tpu.memory_space<vmem>>, vector<1x16x64xf32>
    %38 = vector.shape_cast %37 : vector<1x16x64xf32> to vector<16x64xf32>
    %cst_47 = arith.constant dense<0.000000e+00> : vector<64x64xf32>
    %39 = tpu.matmul %36, %38, %cst_47 {dimension_numbers = #tpu.dot_dimension_numbers<[1], [0], [0], [1], [0, 0, 1, 1], [], []>} : vector<64x16xf32>, vector<16x64xf32>, vector<64x64xf32> -> vector<64x64xf32>
    %40 = arith.addf %34, %39 : vector<64x64xf32>
    %c0_48 = arith.constant 0 : index
    %c2_49 = arith.constant 2 : index
    %c1_50 = arith.constant 1 : index
    %c0_51 = arith.constant 0 : index
    %41 = vector.load %arg1[%c0_48, %c2_49, %c1_50, %c0_51] : memref<1x10x10x16xf32, #tpu.memory_space<vmem>>, vector<1x8x8x16xf32>
    %42 = vector.shape_cast %41 : vector<1x8x8x16xf32> to vector<64x16xf32>
    %c7 = arith.constant 7 : index
    %c0_52 = arith.constant 0 : index
    %c0_53 = arith.constant 0 : index
    %43 = vector.load %arg2[%c7, %c0_52, %c0_53] : memref<9x16x64xf32, #tpu.memory_space<vmem>>, vector<1x16x64xf32>
    %44 = vector.shape_cast %43 : vector<1x16x64xf32> to vector<16x64xf32>
    %cst_54 = arith.constant dense<0.000000e+00> : vector<64x64xf32>
    %45 = tpu.matmul %42, %44, %cst_54 {dimension_numbers = #tpu.dot_dimension_numbers<[1], [0], [0], [1], [0, 0, 1, 1], [], []>} : vector<64x16xf32>, vector<16x64xf32>, vector<64x64xf32> -> vector<64x64xf32>
    %46 = arith.addf %40, %45 : vector<64x64xf32>
    %c0_55 = arith.constant 0 : index
    %c2_56 = arith.constant 2 : index
    %c2_57 = arith.constant 2 : index
    %c0_58 = arith.constant 0 : index
    %47 = vector.load %arg1[%c0_55, %c2_56, %c2_57, %c0_58] : memref<1x10x10x16xf32, #tpu.memory_space<vmem>>, vector<1x8x8x16xf32>
    %48 = vector.shape_cast %47 : vector<1x8x8x16xf32> to vector<64x16xf32>
    %c8 = arith.constant 8 : index
    %c0_59 = arith.constant 0 : index
    %c0_60 = arith.constant 0 : index
    %49 = vector.load %arg2[%c8, %c0_59, %c0_60] : memref<9x16x64xf32, #tpu.memory_space<vmem>>, vector<1x16x64xf32>
    %50 = vector.shape_cast %49 : vector<1x16x64xf32> to vector<16x64xf32>
    %cst_61 = arith.constant dense<0.000000e+00> : vector<64x64xf32>
    %51 = tpu.matmul %48, %50, %cst_61 {dimension_numbers = #tpu.dot_dimension_numbers<[1], [0], [0], [1], [0, 0, 1, 1], [], []>} : vector<64x16xf32>, vector<16x64xf32>, vector<64x64xf32> -> vector<64x64xf32>
    %52 = arith.addf %46, %51 : vector<64x64xf32>
    %c0_62 = arith.constant 0 : index
    %c0_63 = arith.constant 0 : index
    %53 = vector.load %arg5[%c0_62, %c0_63] : memref<1x64xf32, #tpu.memory_space<vmem>>, vector<1x64xf32>
    %c0_64 = arith.constant 0 : index
    %c0_65 = arith.constant 0 : index
    %54 = vector.load %arg6[%c0_64, %c0_65] : memref<1x64xf32, #tpu.memory_space<vmem>>, vector<1x64xf32>
    %55 = vector.shape_cast %52 : vector<64x64xf32> to vector<1x64x64xf32>
    %cst_66 = arith.constant dense<0.000000e+00> : vector<1x64xf32>
    %56 = vector.multi_reduction <add>, %55, %cst_66 [1] : vector<1x64x64xf32> to vector<1x64xf32>
    %c0_67 = arith.constant 0 : index
    %c0_68 = arith.constant 0 : index
    %57 = vector.load %arg4[%c0_67, %c0_68] : memref<64x64xf32, #tpu.memory_space<vmem>>, vector<64x64xf32>
    %cst_69 = arith.constant dense<0.000000e+00> : vector<1x64xf32>
    %58 = tpu.matmul %56, %57, %cst_69 {dimension_numbers = #tpu.dot_dimension_numbers<[1], [0], [0], [1], [0, 0, 1, 1], [], []>} : vector<1x64xf32>, vector<64x64xf32>, vector<1x64xf32> -> vector<1x64xf32>
    %59 = vector.shape_cast %58 : vector<1x64xf32> to vector<1x1x64xf32>
    %60 = vector.broadcast %59 : vector<1x1x64xf32> to vector<1x64x64xf32>
    %61 = arith.subf %55, %60 : vector<1x64x64xf32>
    %62 = arith.mulf %61, %61 : vector<1x64x64xf32>
    %cst_70 = arith.constant dense<0.000000e+00> : vector<1x64xf32>
    %63 = vector.multi_reduction <add>, %62, %cst_70 [1] : vector<1x64x64xf32> to vector<1x64xf32>
    %c0_71 = arith.constant 0 : index
    %c0_72 = arith.constant 0 : index
    %64 = vector.load %arg4[%c0_71, %c0_72] : memref<64x64xf32, #tpu.memory_space<vmem>>, vector<64x64xf32>
    %cst_73 = arith.constant dense<0.000000e+00> : vector<1x64xf32>
    %65 = tpu.matmul %63, %64, %cst_73 {dimension_numbers = #tpu.dot_dimension_numbers<[1], [0], [0], [1], [0, 0, 1, 1], [], []>} : vector<1x64xf32>, vector<64x64xf32>, vector<1x64xf32> -> vector<1x64xf32>
    %cst_74 = arith.constant 9.99999974E-6 : f32
    %66 = vector.broadcast %cst_74 : f32 to vector<1x64xf32>
    %67 = arith.addf %65, %66 : vector<1x64xf32>
    %68 = math.rsqrt %67 : vector<1x64xf32>
    %69 = arith.mulf %53, %68 : vector<1x64xf32>
    %70 = arith.mulf %58, %69 : vector<1x64xf32>
    %71 = arith.subf %54, %70 : vector<1x64xf32>
    %72 = vector.shape_cast %69 : vector<1x64xf32> to vector<1x1x64xf32>
    %73 = vector.broadcast %72 : vector<1x1x64xf32> to vector<1x64x64xf32>
    %74 = arith.mulf %55, %73 : vector<1x64x64xf32>
    %75 = vector.shape_cast %71 : vector<1x64xf32> to vector<1x1x64xf32>
    %76 = vector.broadcast %75 : vector<1x1x64xf32> to vector<1x64x64xf32>
    %77 = arith.addf %74, %76 : vector<1x64x64xf32>
    %cst_75 = arith.constant 0.000000e+00 : f32
    %78 = vector.broadcast %cst_75 : f32 to vector<1x64x64xf32>
    %79 = arith.maximumf %77, %78 : vector<1x64x64xf32>
    %cst_76 = arith.constant 0.000000e+00 : f32
    %80 = vector.broadcast %cst_76 : f32 to vector<1x10x10x64xf32>
    %c0_77 = arith.constant 0 : index
    %c0_78 = arith.constant 0 : index
    %c0_79 = arith.constant 0 : index
    %c0_80 = arith.constant 0 : index
    %81 = vector.load %arg13[%c0_77, %c0_78, %c0_79, %c0_80] : memref<1x10x10x64xf32, #tpu.memory_space<vmem>>, vector<1x10x10x64xf32>
    tpu.vector_store %arg13[%c0_77, %c0_78, %c0_79, %c0_80], %80 {strides = array<i32>} : memref<1x10x10x64xf32, #tpu.memory_space<vmem>>, vector<1x10x10x64xf32>,
    %82 = vector.shape_cast %79 : vector<1x64x64xf32> to vector<1x8x8x64xf32>
    %c0_81 = arith.constant 0 : index
    %c1_82 = arith.constant 1 : index
    %c1_83 = arith.constant 1 : index
    %c0_84 = arith.constant 0 : index
    %83 = vector.load %arg13[%c0_81, %c1_82, %c1_83, %c0_84] : memref<1x10x10x64xf32, #tpu.memory_space<vmem>>, vector<1x8x8x64xf32>
    tpu.vector_store %arg13[%c0_81, %c1_82, %c1_83, %c0_84], %82 {strides = array<i32>} : memref<1x10x10x64xf32, #tpu.memory_space<vmem>>, vector<1x8x8x64xf32>,
    %c0_85 = arith.constant 0 : index
    %c0_86 = arith.constant 0 : index
    %c0_87 = arith.constant 0 : index
    %c0_88 = arith.constant 0 : index
    %84 = vector.load %arg13[%c0_85, %c0_86, %c0_87, %c0_88] : memref<1x10x10x64xf32, #tpu.memory_space<vmem>>, vector<1x8x8x64xf32>
    %85 = vector.shape_cast %84 : vector<1x8x8x64xf32> to vector<64x64xf32>
    %c0_89 = arith.constant 0 : index
    %c0_90 = arith.constant 0 : index
    %c0_91 = arith.constant 0 : index
    %86 = vector.load %arg3[%c0_89, %c0_90, %c0_91] : memref<9x64x64xf32, #tpu.memory_space<vmem>>, vector<1x64x64xf32>
    %87 = vector.shape_cast %86 : vector<1x64x64xf32> to vector<64x64xf32>
    %cst_92 = arith.constant dense<0.000000e+00> : vector<64x64xf32>
    %88 = tpu.matmul %85, %87, %cst_92 {dimension_numbers = #tpu.dot_dimension_numbers<[1], [0], [0], [1], [0, 0, 1, 1], [], []>} : vector<64x64xf32>, vector<64x64xf32>, vector<64x64xf32> -> vector<64x64xf32>
    %c0_93 = arith.constant 0 : index
    %c0_94 = arith.constant 0 : index
    %c1_95 = arith.constant 1 : index
    %c0_96 = arith.constant 0 : index
    %89 = vector.load %arg13[%c0_93, %c0_94, %c1_95, %c0_96] : memref<1x10x10x64xf32, #tpu.memory_space<vmem>>, vector<1x8x8x64xf32>
    %90 = vector.shape_cast %89 : vector<1x8x8x64xf32> to vector<64x64xf32>
    %c1_97 = arith.constant 1 : index
    %c0_98 = arith.constant 0 : index
    %c0_99 = arith.constant 0 : index
    %91 = vector.load %arg3[%c1_97, %c0_98, %c0_99] : memref<9x64x64xf32, #tpu.memory_space<vmem>>, vector<1x64x64xf32>
    %92 = vector.shape_cast %91 : vector<1x64x64xf32> to vector<64x64xf32>
    %cst_100 = arith.constant dense<0.000000e+00> : vector<64x64xf32>
    %93 = tpu.matmul %90, %92, %cst_100 {dimension_numbers = #tpu.dot_dimension_numbers<[1], [0], [0], [1], [0, 0, 1, 1], [], []>} : vector<64x64xf32>, vector<64x64xf32>, vector<64x64xf32> -> vector<64x64xf32>
    %94 = arith.addf %88, %93 : vector<64x64xf32>
    %c0_101 = arith.constant 0 : index
    %c0_102 = arith.constant 0 : index
    %c2_103 = arith.constant 2 : index
    %c0_104 = arith.constant 0 : index
    %95 = vector.load %arg13[%c0_101, %c0_102, %c2_103, %c0_104] : memref<1x10x10x64xf32, #tpu.memory_space<vmem>>, vector<1x8x8x64xf32>
    %96 = vector.shape_cast %95 : vector<1x8x8x64xf32> to vector<64x64xf32>
    %c2_105 = arith.constant 2 : index
    %c0_106 = arith.constant 0 : index
    %c0_107 = arith.constant 0 : index
    %97 = vector.load %arg3[%c2_105, %c0_106, %c0_107] : memref<9x64x64xf32, #tpu.memory_space<vmem>>, vector<1x64x64xf32>
    %98 = vector.shape_cast %97 : vector<1x64x64xf32> to vector<64x64xf32>
    %cst_108 = arith.constant dense<0.000000e+00> : vector<64x64xf32>
    %99 = tpu.matmul %96, %98, %cst_108 {dimension_numbers = #tpu.dot_dimension_numbers<[1], [0], [0], [1], [0, 0, 1, 1], [], []>} : vector<64x64xf32>, vector<64x64xf32>, vector<64x64xf32> -> vector<64x64xf32>
    %100 = arith.addf %94, %99 : vector<64x64xf32>
    %c0_109 = arith.constant 0 : index
    %c1_110 = arith.constant 1 : index
    %c0_111 = arith.constant 0 : index
    %c0_112 = arith.constant 0 : index
    %101 = vector.load %arg13[%c0_109, %c1_110, %c0_111, %c0_112] : memref<1x10x10x64xf32, #tpu.memory_space<vmem>>, vector<1x8x8x64xf32>
    %102 = vector.shape_cast %101 : vector<1x8x8x64xf32> to vector<64x64xf32>
    %c3_113 = arith.constant 3 : index
    %c0_114 = arith.constant 0 : index
    %c0_115 = arith.constant 0 : index
    %103 = vector.load %arg3[%c3_113, %c0_114, %c0_115] : memref<9x64x64xf32, #tpu.memory_space<vmem>>, vector<1x64x64xf32>
    %104 = vector.shape_cast %103 : vector<1x64x64xf32> to vector<64x64xf32>
    %cst_116 = arith.constant dense<0.000000e+00> : vector<64x64xf32>
    %105 = tpu.matmul %102, %104, %cst_116 {dimension_numbers = #tpu.dot_dimension_numbers<[1], [0], [0], [1], [0, 0, 1, 1], [], []>} : vector<64x64xf32>, vector<64x64xf32>, vector<64x64xf32> -> vector<64x64xf32>
    %106 = arith.addf %100, %105 : vector<64x64xf32>
    %c0_117 = arith.constant 0 : index
    %c1_118 = arith.constant 1 : index
    %c1_119 = arith.constant 1 : index
    %c0_120 = arith.constant 0 : index
    %107 = vector.load %arg13[%c0_117, %c1_118, %c1_119, %c0_120] : memref<1x10x10x64xf32, #tpu.memory_space<vmem>>, vector<1x8x8x64xf32>
    %108 = vector.shape_cast %107 : vector<1x8x8x64xf32> to vector<64x64xf32>
    %c4_121 = arith.constant 4 : index
    %c0_122 = arith.constant 0 : index
    %c0_123 = arith.constant 0 : index
    %109 = vector.load %arg3[%c4_121, %c0_122, %c0_123] : memref<9x64x64xf32, #tpu.memory_space<vmem>>, vector<1x64x64xf32>
    %110 = vector.shape_cast %109 : vector<1x64x64xf32> to vector<64x64xf32>
    %cst_124 = arith.constant dense<0.000000e+00> : vector<64x64xf32>
    %111 = tpu.matmul %108, %110, %cst_124 {dimension_numbers = #tpu.dot_dimension_numbers<[1], [0], [0], [1], [0, 0, 1, 1], [], []>} : vector<64x64xf32>, vector<64x64xf32>, vector<64x64xf32> -> vector<64x64xf32>
    %112 = arith.addf %106, %111 : vector<64x64xf32>
    %c0_125 = arith.constant 0 : index
    %c1_126 = arith.constant 1 : index
    %c2_127 = arith.constant 2 : index
    %c0_128 = arith.constant 0 : index
    %113 = vector.load %arg13[%c0_125, %c1_126, %c2_127, %c0_128] : memref<1x10x10x64xf32, #tpu.memory_space<vmem>>, vector<1x8x8x64xf32>
    %114 = vector.shape_cast %113 : vector<1x8x8x64xf32> to vector<64x64xf32>
    %c5_129 = arith.constant 5 : index
    %c0_130 = arith.constant 0 : index
    %c0_131 = arith.constant 0 : index
    %115 = vector.load %arg3[%c5_129, %c0_130, %c0_131] : memref<9x64x64xf32, #tpu.memory_space<vmem>>, vector<1x64x64xf32>
    %116 = vector.shape_cast %115 : vector<1x64x64xf32> to vector<64x64xf32>
    %cst_132 = arith.constant dense<0.000000e+00> : vector<64x64xf32>
    %117 = tpu.matmul %114, %116, %cst_132 {dimension_numbers = #tpu.dot_dimension_numbers<[1], [0], [0], [1], [0, 0, 1, 1], [], []>} : vector<64x64xf32>, vector<64x64xf32>, vector<64x64xf32> -> vector<64x64xf32>
    %118 = arith.addf %112, %117 : vector<64x64xf32>
    %c0_133 = arith.constant 0 : index
    %c2_134 = arith.constant 2 : index
    %c0_135 = arith.constant 0 : index
    %c0_136 = arith.constant 0 : index
    %119 = vector.load %arg13[%c0_133, %c2_134, %c0_135, %c0_136] : memref<1x10x10x64xf32, #tpu.memory_space<vmem>>, vector<1x8x8x64xf32>
    %120 = vector.shape_cast %119 : vector<1x8x8x64xf32> to vector<64x64xf32>
    %c6_137 = arith.constant 6 : index
    %c0_138 = arith.constant 0 : index
    %c0_139 = arith.constant 0 : index
    %121 = vector.load %arg3[%c6_137, %c0_138, %c0_139] : memref<9x64x64xf32, #tpu.memory_space<vmem>>, vector<1x64x64xf32>
    %122 = vector.shape_cast %121 : vector<1x64x64xf32> to vector<64x64xf32>
    %cst_140 = arith.constant dense<0.000000e+00> : vector<64x64xf32>
    %123 = tpu.matmul %120, %122, %cst_140 {dimension_numbers = #tpu.dot_dimension_numbers<[1], [0], [0], [1], [0, 0, 1, 1], [], []>} : vector<64x64xf32>, vector<64x64xf32>, vector<64x64xf32> -> vector<64x64xf32>
    %124 = arith.addf %118, %123 : vector<64x64xf32>
    %c0_141 = arith.constant 0 : index
    %c2_142 = arith.constant 2 : index
    %c1_143 = arith.constant 1 : index
    %c0_144 = arith.constant 0 : index
    %125 = vector.load %arg13[%c0_141, %c2_142, %c1_143, %c0_144] : memref<1x10x10x64xf32, #tpu.memory_space<vmem>>, vector<1x8x8x64xf32>
    %126 = vector.shape_cast %125 : vector<1x8x8x64xf32> to vector<64x64xf32>
    %c7_145 = arith.constant 7 : index
    %c0_146 = arith.constant 0 : index
    %c0_147 = arith.constant 0 : index
    %127 = vector.load %arg3[%c7_145, %c0_146, %c0_147] : memref<9x64x64xf32, #tpu.memory_space<vmem>>, vector<1x64x64xf32>
    %128 = vector.shape_cast %127 : vector<1x64x64xf32> to vector<64x64xf32>
    %cst_148 = arith.constant dense<0.000000e+00> : vector<64x64xf32>
    %129 = tpu.matmul %126, %128, %cst_148 {dimension_numbers = #tpu.dot_dimension_numbers<[1], [0], [0], [1], [0, 0, 1, 1], [], []>} : vector<64x64xf32>, vector<64x64xf32>, vector<64x64xf32> -> vector<64x64xf32>
    %130 = arith.addf %124, %129 : vector<64x64xf32>
    %c0_149 = arith.constant 0 : index
    %c2_150 = arith.constant 2 : index
    %c2_151 = arith.constant 2 : index
    %c0_152 = arith.constant 0 : index
    %131 = vector.load %arg13[%c0_149, %c2_150, %c2_151, %c0_152] : memref<1x10x10x64xf32, #tpu.memory_space<vmem>>, vector<1x8x8x64xf32>
    %132 = vector.shape_cast %131 : vector<1x8x8x64xf32> to vector<64x64xf32>
    %c8_153 = arith.constant 8 : index
    %c0_154 = arith.constant 0 : index
    %c0_155 = arith.constant 0 : index
    %133 = vector.load %arg3[%c8_153, %c0_154, %c0_155] : memref<9x64x64xf32, #tpu.memory_space<vmem>>, vector<1x64x64xf32>
    %134 = vector.shape_cast %133 : vector<1x64x64xf32> to vector<64x64xf32>
    %cst_156 = arith.constant dense<0.000000e+00> : vector<64x64xf32>
    %135 = tpu.matmul %132, %134, %cst_156 {dimension_numbers = #tpu.dot_dimension_numbers<[1], [0], [0], [1], [0, 0, 1, 1], [], []>} : vector<64x64xf32>, vector<64x64xf32>, vector<64x64xf32> -> vector<64x64xf32>
    %136 = arith.addf %130, %135 : vector<64x64xf32>
    %c0_157 = arith.constant 0 : index
    %c0_158 = arith.constant 0 : index
    %137 = vector.load %arg7[%c0_157, %c0_158] : memref<1x64xf32, #tpu.memory_space<vmem>>, vector<1x64xf32>
    %c0_159 = arith.constant 0 : index
    %c0_160 = arith.constant 0 : index
    %138 = vector.load %arg8[%c0_159, %c0_160] : memref<1x64xf32, #tpu.memory_space<vmem>>, vector<1x64xf32>
    %139 = vector.shape_cast %136 : vector<64x64xf32> to vector<1x64x64xf32>
    %cst_161 = arith.constant dense<0.000000e+00> : vector<1x64xf32>
    %140 = vector.multi_reduction <add>, %139, %cst_161 [1] : vector<1x64x64xf32> to vector<1x64xf32>
    %c0_162 = arith.constant 0 : index
    %c0_163 = arith.constant 0 : index
    %141 = vector.load %arg4[%c0_162, %c0_163] : memref<64x64xf32, #tpu.memory_space<vmem>>, vector<64x64xf32>
    %cst_164 = arith.constant dense<0.000000e+00> : vector<1x64xf32>
    %142 = tpu.matmul %140, %141, %cst_164 {dimension_numbers = #tpu.dot_dimension_numbers<[1], [0], [0], [1], [0, 0, 1, 1], [], []>} : vector<1x64xf32>, vector<64x64xf32>, vector<1x64xf32> -> vector<1x64xf32>
    %143 = vector.shape_cast %142 : vector<1x64xf32> to vector<1x1x64xf32>
    %144 = vector.broadcast %143 : vector<1x1x64xf32> to vector<1x64x64xf32>
    %145 = arith.subf %139, %144 : vector<1x64x64xf32>
    %146 = arith.mulf %145, %145 : vector<1x64x64xf32>
    %cst_165 = arith.constant dense<0.000000e+00> : vector<1x64xf32>
    %147 = vector.multi_reduction <add>, %146, %cst_165 [1] : vector<1x64x64xf32> to vector<1x64xf32>
    %c0_166 = arith.constant 0 : index
    %c0_167 = arith.constant 0 : index
    %148 = vector.load %arg4[%c0_166, %c0_167] : memref<64x64xf32, #tpu.memory_space<vmem>>, vector<64x64xf32>
    %cst_168 = arith.constant dense<0.000000e+00> : vector<1x64xf32>
    %149 = tpu.matmul %147, %148, %cst_168 {dimension_numbers = #tpu.dot_dimension_numbers<[1], [0], [0], [1], [0, 0, 1, 1], [], []>} : vector<1x64xf32>, vector<64x64xf32>, vector<1x64xf32> -> vector<1x64xf32>
    %cst_169 = arith.constant 9.99999974E-6 : f32
    %150 = vector.broadcast %cst_169 : f32 to vector<1x64xf32>
    %151 = arith.addf %149, %150 : vector<1x64xf32>
    %152 = math.rsqrt %151 : vector<1x64xf32>
    %153 = arith.mulf %137, %152 : vector<1x64xf32>
    %154 = arith.mulf %142, %153 : vector<1x64xf32>
    %155 = arith.subf %138, %154 : vector<1x64xf32>
    %156 = vector.shape_cast %153 : vector<1x64xf32> to vector<1x1x64xf32>
    %157 = vector.broadcast %156 : vector<1x1x64xf32> to vector<1x64x64xf32>
    %158 = arith.mulf %139, %157 : vector<1x64x64xf32>
    %159 = vector.shape_cast %155 : vector<1x64xf32> to vector<1x1x64xf32>
    %160 = vector.broadcast %159 : vector<1x1x64xf32> to vector<1x64x64xf32>
    %161 = arith.addf %158, %160 : vector<1x64x64xf32>
    %cst_170 = arith.constant 0.000000e+00 : f32
    %162 = vector.broadcast %cst_170 : f32 to vector<1x64x64xf32>
    %163 = arith.maximumf %161, %162 : vector<1x64x64xf32>
    %c0_171 = arith.constant 0 : index
    %c0_172 = arith.constant 0 : index
    %c0_173 = arith.constant 0 : index
    %164 = vector.load %arg11[%c0_171, %c0_172, %c0_173] : memref<1x64x64xf32, #tpu.memory_space<vmem>>, vector<1x64x64xf32>
    tpu.vector_store %arg11[%c0_171, %c0_172, %c0_173], %163 {strides = array<i32>} : memref<1x64x64xf32, #tpu.memory_space<vmem>>, vector<1x64x64xf32>,
    %165 = vector.shape_cast %163 : vector<1x64x64xf32> to vector<64x64xf32>
    %c0_174 = arith.constant 0 : index
    %c0_175 = arith.constant 0 : index
    %166 = vector.load %arg9[%c0_174, %c0_175] : memref<64x24xf32, #tpu.memory_space<vmem>>, vector<64x24xf32>
    %cst_176 = arith.constant dense<0.000000e+00> : vector<64x24xf32>
    %167 = tpu.matmul %165, %166, %cst_176 {dimension_numbers = #tpu.dot_dimension_numbers<[1], [0], [0], [1], [0, 0, 1, 1], [], []>} : vector<64x64xf32>, vector<64x24xf32>, vector<64x24xf32> -> vector<64x24xf32>
    %c0_177 = arith.constant 0 : index
    %c0_178 = arith.constant 0 : index
    %168 = vector.load %arg10[%c0_177, %c0_178] : memref<1x24xf32, #tpu.memory_space<vmem>>, vector<1x24xf32>
    %169 = vector.broadcast %168 : vector<1x24xf32> to vector<64x24xf32>
    %170 = arith.addf %167, %169 : vector<64x24xf32>
    %171 = vector.shape_cast %170 : vector<64x24xf32> to vector<1x64x24xf32>
    %c0_179 = arith.constant 0 : index
    %c0_180 = arith.constant 0 : index
    %c0_181 = arith.constant 0 : index
    %172 = vector.load %arg12[%c0_179, %c0_180, %c0_181] : memref<1x64x24xf32, #tpu.memory_space<vmem>>, vector<1x64x24xf32>
    tpu.vector_store %arg12[%c0_179, %c0_180, %c0_181], %171 {strides = array<i32>} : memref<1x64x24xf32, #tpu.memory_space<vmem>>, vector<1x64x24xf32>,
    return
  }
  func.func @transform_0(%arg0: i32) -> (i32, i32, i32, i32) {
    %c0_i32 = arith.constant 0 : i32
    %c0_i32_0 = arith.constant 0 : i32
    %c0_i32_1 = arith.constant 0 : i32
    %c0_i32_2 = arith.constant 0 : i32
    return %arg0, %c0_i32, %c0_i32_0, %c0_i32_1 : i32, i32, i32, i32
  }
  func.func @transform_1(%arg0: i32) -> (i32, i32, i32) {
    %c0_i32 = arith.constant 0 : i32
    %c0_i32_0 = arith.constant 0 : i32
    %c0_i32_1 = arith.constant 0 : i32
    %c0_i32_2 = arith.constant 0 : i32
    return %c0_i32, %c0_i32_0, %c0_i32_1 : i32, i32, i32
  }
  func.func @transform_2(%arg0: i32) -> (i32, i32, i32) {
    %c0_i32 = arith.constant 0 : i32
    %c0_i32_0 = arith.constant 0 : i32
    %c0_i32_1 = arith.constant 0 : i32
    %c0_i32_2 = arith.constant 0 : i32
    return %c0_i32, %c0_i32_0, %c0_i32_1 : i32, i32, i32
  }
  func.func @transform_3(%arg0: i32) -> (i32, i32) {
    %c0_i32 = arith.constant 0 : i32
    %c0_i32_0 = arith.constant 0 : i32
    %c0_i32_1 = arith.constant 0 : i32
    return %c0_i32, %c0_i32_0 : i32, i32
  }
  func.func @transform_4(%arg0: i32) -> (i32, i32) {
    %c0_i32 = arith.constant 0 : i32
    %c0_i32_0 = arith.constant 0 : i32
    %c0_i32_1 = arith.constant 0 : i32
    return %c0_i32, %c0_i32_0 : i32, i32
  }
  func.func @transform_5(%arg0: i32) -> (i32, i32) {
    %c0_i32 = arith.constant 0 : i32
    %c0_i32_0 = arith.constant 0 : i32
    %c0_i32_1 = arith.constant 0 : i32
    return %c0_i32, %c0_i32_0 : i32, i32
  }
  func.func @transform_6(%arg0: i32) -> (i32, i32) {
    %c0_i32 = arith.constant 0 : i32
    %c0_i32_0 = arith.constant 0 : i32
    %c0_i32_1 = arith.constant 0 : i32
    return %c0_i32, %c0_i32_0 : i32, i32
  }
  func.func @transform_7(%arg0: i32) -> (i32, i32) {
    %c0_i32 = arith.constant 0 : i32
    %c0_i32_0 = arith.constant 0 : i32
    %c0_i32_1 = arith.constant 0 : i32
    return %c0_i32, %c0_i32_0 : i32, i32
  }
  func.func @transform_8(%arg0: i32) -> (i32, i32) {
    %c0_i32 = arith.constant 0 : i32
    %c0_i32_0 = arith.constant 0 : i32
    %c0_i32_1 = arith.constant 0 : i32
    return %c0_i32, %c0_i32_0 : i32, i32
  }
  func.func @transform_9(%arg0: i32) -> (i32, i32) {
    %c0_i32 = arith.constant 0 : i32
    %c0_i32_0 = arith.constant 0 : i32
    %c0_i32_1 = arith.constant 0 : i32
    return %c0_i32, %c0_i32_0 : i32, i32
  }
  func.func @transform_10(%arg0: i32) -> (i32, i32, i32) {
    %c0_i32 = arith.constant 0 : i32
    %c0_i32_0 = arith.constant 0 : i32
    %c0_i32_1 = arith.constant 0 : i32
    return %arg0, %c0_i32, %c0_i32_0 : i32, i32, i32
  }
  func.func @transform_11(%arg0: i32) -> (i32, i32, i32) {
    %c0_i32 = arith.constant 0 : i32
    %c0_i32_0 = arith.constant 0 : i32
    %c0_i32_1 = arith.constant 0 : i32
    return %arg0, %c0_i32, %c0_i32_0 : i32, i32, i32
  }
}

</mosaic_0001>

<bundles_post_ra>
// kernel: dec_block_forward.1
= control target key start
LH: loop header
LB: loop body
LE: loop exit
PB: predicated region body
PF: predicated region fallthrough
CT: control target
= control target key end

     0   :  { %s2849_s17 = smov 0   ;;  %s3861_s0 = inlined_call_operand.vmem [shape: f32[2,10,10,16], index: 0, kind: input, shape index: {}]   ;;  %s3862_s1 = inlined_call_operand.vmem [shape: f32[9,16,64], index: 1, kind: input, shape index: {}]   ;;  %s3863_s2 = inlined_call_operand.vmem [shape: f32[9,64,64], index: 2, kind: input, shape index: {}]   ;;  %s3864_s3 = inlined_call_operand.vmem [shape: f32[64,64], index: 3, kind: input, shape index: {}]   ;;  %s3865_s4 = inlined_call_operand.vmem [shape: f32[1,64], index: 4, kind: input, shape index: {}]   ;;  %s3866_s5 = inlined_call_operand.vmem [shape: f32[1,64], index: 5, kind: input, shape index: {}]   ;;  %s3867_s6 = inlined_call_operand.vmem [shape: f32[1,64], index: 6, kind: input, shape index: {}]   ;;  %s3868_s7 = inlined_call_operand.vmem [shape: f32[1,64], index: 7, kind: input, shape index: {}]   ;;  %s3869_s8 = inlined_call_operand.vmem [shape: f32[64,24], index: 8, kind: input, shape index: {}]   ;;  %s3870_s9 = inlined_call_operand.vmem [shape: f32[1,24], index: 9, kind: input, shape index: {}]   ;;  %s3871_s10 = inlined_call_operand.vmem [shape: f32[2,64,64], index: 10, kind: output, shape index: {0}]   ;;  %s3872_s11 = inlined_call_operand.vmem [shape: f32[2,64,24], index: 11, kind: output, shape index: {1}]  }
   0x1 LB: > { %s2465_s18 = sadd.s32 4294967295, %s2786_s17   ;;  %p2469_p0 = scmp.ge.s32.totalorder %s2786_s17, 1  ;;  %s2786_s17 = sphi %s2849_s17, %s22_s17  }
   0x2   : > { %p340_p1 = scmp.lt.s32.totalorder %s2786_s17, 3 }
   0x4   : > { %p341_p2 = pnand %p2469_p0, %p340_p1 }
   0x6   : > { %344 = sbr.rel (%p341_p2) target bundleno = 1509 (0x5e5), region = 60 }
   0xb   : > { %v2476_v0 = vld [vmem:[%s3862_s1 + $0x18] sm:$0xff]  ;;  %v409_v1 = vld [vmem:[%s3862_s1 + $0x8] sm:$0xff]  ;;  %v2475_v2 = vld [vmem:[%s3862_s1 + $0x10] sm:$0xff]  ;;  %p385_p3 = scmp.lt.s32.totalorder %s2465_s18, 1  ;;  %vm421_vm0 = vcmask 130048   ;;  %vm1144_vm1 = vcmask 523264  }
   0xc   : > { %460 = vmatpush.msra.mxu0 %v2476_v0  ;;  %525 = vmatpush.msra.mxu1 %v409_v1  ;;  %v408_v3 = vld [vmem:[%s3862_s1] sm:$0xff]  ;;  %v2530_v4 = vld [vmem:[%s3862_s1 + $0x48] sm:$0xff]  ;;  %v2512_v6 = vld [vmem:[%s3862_s1 + $0x38] sm:$0xff]  ;;  %vm1302_vm2 = vcmask 517120   ;;  %vm2368_vm9 = vcmask 195584  }
   0xd   : > { %2763 = vmatpush.msra.mxu2 %v409_v1  ;;  %s3882_s18 = smov (!%p385_p3, %s2465_s18), 1  ;;  %v2494_v5 = vld [vmem:[%s3862_s1 + $0x28] sm:$0xff]  ;;  %v2493_v7 = vld [vmem:[%s3862_s1 + $0x20] sm:$0xff]  ;;  %686 = vmatpush.msra.mxu3 %v2512_v6  ;;  %v2511_v12 = vld [vmem:[%s3862_s1 + $0x30] sm:$0xff] }
   0xe   : > { %461 = vmatpush.msra.mxu0 %v2475_v2  ;;  %526 = vmatpush.msra.mxu1 %v408_v3  ;;  %s2765_s14 = smul.u32 160, %s3882_s18  ;;  %v2529_v11 = vld [vmem:[%s3862_s1 + $0x40] sm:$0xff]  ;;  %v2566_v19 = vld [vmem:[%s3862_s1 + $0x68] sm:$0xff]  ;;  %v2584_v23 = vld [vmem:[%s3862_s1 + $0x78] sm:$0xff]  ;;  %s2761_s22 = sshll.u32 %s3882_s18, 6 }
   0xf   : > { %2764 = vmatpush.msra.mxu2 %v408_v3  ;;  %687 = vmatpush.msra.mxu3 %v2511_v12  ;;  %v2548_v24 = vld [vmem:[%s3862_s1 + $0x58] sm:$0xff]  ;;  %v2602_v27 = vld [vmem:[%s3862_s1 + $0x88] sm:$0xff]  ;;  %v2547_v28 = vld [vmem:[%s3862_s1 + $0x50] sm:$0xff]  ;;  %s394_s25 = scalar_lea.vmem %s3871_s10, %s2761_s22  ;;  %s399_s29 = scalar_lea.vmem %s3872_s11, %s2761_s22 }
  0x10   : > { %770 = vmatpush.msrb.mxu0 %v2530_v4  ;;  %s2887_s21 = scalar_lea.vmem %s3861_s0, %s2765_s14  ;;  %854 = vmatpush.msrb.mxu1 %v2548_v24  ;;  %v2565_v33 = vld [vmem:[%s3862_s1 + $0x60] sm:$0xff]  ;;  %v2583_v36 = vld [vmem:[%s3862_s1 + $0x70] sm:$0xff]  ;;  %v1173_v24 = vld [vmem:[%s3864_s3 + $0x38] sm:$0xff] }
  0x11   : > { %601 = vmatpush.msrb.mxu2 %v2494_v5  ;;  %v410_v8 = vld [vmem:[%s2887_s21 + $0x1] sm:$0xff]  ;;  %v2905_v13 = vld [vmem:[%s2887_s21 + $0x11] sm:$0xff]  ;;  %1023 = vmatpush.msrb.mxu3 %v2584_v23 }
  0x12   : > { %v400_v9 = vld [vmem:[%s2887_s21] sm:$0xff]  ;;  %2477 = vmatmul.msk.f32.vlgmr.msra.gmra.mxu0 %vm421_vm0, %v410_v8  ;;  %v401_v14 = vld [vmem:[%s2887_s21 + $0x10] sm:$0xff]  ;;  %855 = vmatpush.msrb.mxu1 %v2547_v28 }
  0x13   : > { %v2892_v10 = vld [vmem:[%s2887_s21 + $0x40] sm:$0xff]  ;;  %602 = vmatpush.msrb.mxu2 %v2493_v7  ;;  %2485 = vmatmul.msk.f32.vlgmr.msra.gmra.mxu1 %vm421_vm0, %v400_v9  ;;  %v2909_v15 = vld [vmem:[%s2887_s21 + $0x50] sm:$0xff] }
  0x14   : > { %2489 = vmatmul.msk.f32.vlgmr.msra.gmra.mxu2 %vm421_vm0, %v2892_v10  ;;  %771 = vmatpush.msrb.mxu0 %v2529_v11  ;;  %v412_v16 = vld [vmem:[%s2887_s21 + $0x21] sm:$0xff]  ;;  %v413_v20 = vld [vmem:[%s2887_s21 + $0x31] sm:$0xff] }
  0x15   : > { %2513 = vmatmul.msk.f32.vlgmr.msra.gmra.mxu3 %vm421_vm0, %v401_v14  ;;  %v2919_v17 = vld [vmem:[%s2887_s21 + $0x20] sm:$0xff]  ;;  %939 = vmatpush.msra.mxu2 %v2566_v19  ;;  %v2936_v21 = vld [vmem:[%s2887_s21 + $0x30] sm:$0xff] }
  0x16   : > { %v2922_v18 = vld [vmem:[%s2887_s21 + $0x60] sm:$0xff]  ;;  %v2939_v22 = vld [vmem:[%s2887_s21 + $0x70] sm:$0xff]  ;;  %1107 = vmatpush.msra.mxu0 %v2602_v27  ;;  %1024 = vmatpush.msrb.mxu3 %v2583_v36 }
  0x17   : > { %v414_v25 = vld [vmem:[%s2887_s21 + $0x41] sm:$0xff]  ;;  %v553_v29 = vld [vmem:[%s2887_s21 + $0x12] sm:$0xff]  ;;  %940 = vmatpush.msra.mxu2 %v2565_v33  ;;  %1185 = vmatpush.msra.mxu1 %v1173_v24 }
  0x18   : > { %v552_v26 = vld [vmem:[%s2887_s21 + $0x2] sm:$0xff]  ;;  %v415_v30 = vld [vmem:[%s2887_s21 + $0x51] sm:$0xff] }
  0x19   : > { %v554_v31 = vld [vmem:[%s2887_s21 + $0x22] sm:$0xff]  ;;  %v555_v34 = vld [vmem:[%s2887_s21 + $0x32] sm:$0xff] }
  0x1a   : > { %2478 = vmatmul.msk.f32.gmra.mxu0 %vm421_vm0, %v2905_v13  ;;  %v416_v32 = vld [vmem:[%s2887_s21 + $0x61] sm:$0xff]  ;;  %v417_v35 = vld [vmem:[%s2887_s21 + $0x71] sm:$0xff] }
  0x1b   : > { %2486 = vmatmul.msk.f32.gmra.mxu1 %vm421_vm0, %v401_v14  ;;  %v556_v37 = vld [vmem:[%s2887_s21 + $0x42] sm:$0xff]  ;;  %v557_v40 = vld [vmem:[%s2887_s21 + $0x52] sm:$0xff] }
  0x1c   : > { %2490 = vmatmul.msk.f32.gmra.mxu2 %vm421_vm0, %v2909_v15  ;;  %v2510_v38 = vld [vmem:[%s2887_s21 + $0x80] sm:$0xff]  ;;  %v559_v42 = vld [vmem:[%s2887_s21 + $0x72] sm:$0xff]  ;;  %v1171_v33 = vld [vmem:[%s3864_s3 + $0x28] sm:$0xff] }
  0x1d   : > { %2514 = vmatmul.msk.f32.gmra.mxu3 %vm421_vm0, %v2919_v17  ;;  %v2601_v39 = vld [vmem:[%s3862_s1 + $0x80] sm:$0xff]  ;;  %v2582_v45 = vld [vmem:[%s2887_s21 + $0x91] sm:$0xff] }
  0x1e   : > { %1108 = vmatpush.msra.mxu0 %v2601_v39  ;;  %v558_v41 = vld [vmem:[%s2887_s21 + $0x62] sm:$0xff]  ;;  %v2564_v53 = vld [vmem:[%s2887_s21 + $0x90] sm:$0xff] }
  0x1f   : > { %v2546_v43 = vld [vmem:[%s2887_s21 + $0x82] sm:$0xff]  ;;  %v2600_v1 = vld [vmem:[%s2887_s21 + $0x92] sm:$0xff] }
  0x20   : > { %v2528_v44 = vld [vmem:[%s2887_s21 + $0x81] sm:$0xff] }
  0x22   : > { %2479 = vmatmul.msk.f32.gmra.mxu0 %vm421_vm0, %v412_v16 }
  0x23   : > { %2487 = vmatmul.msk.f32.gmra.mxu1 %vm421_vm0, %v2919_v17 }
  0x24   : > { %2491 = vmatmul.msk.f32.gmra.mxu2 %vm421_vm0, %v2922_v18 }
  0x25   : > { %2515 = vmatmul.msk.f32.gmra.mxu3 %vm421_vm0, %v2936_v21 }
  0x2a   : > { %2480 = vmatmul.msk.f32.gmra.mxu0 %vm421_vm0, %v413_v20 }
  0x2b   : > { %2488 = vmatmul.msk.f32.gmra.mxu1 %vm421_vm0, %v2936_v21 }
  0x2c   : > { %2492 = vmatmul.msk.f32.gmra.mxu2 %vm421_vm0, %v2939_v22 }
  0x2d   : > { %2516 = vmatmul.msk.f32.gmra.mxu3 %vm421_vm0, %v2892_v10 }
  0x32   : > { %2481 = vmatmul.msk.f32.gmra.mxu0 %vm421_vm0, %v414_v25 }
  0x33   : > { %2549 = vmatmul.msk.f32.vlgmr.msrb.gmra.mxu1 %vm421_vm0, %v553_v29 }
  0x34   : > { %2495 = vmatmul.msk.f32.vlgmr.msrb.gmra.mxu2 %vm421_vm0, %v552_v26 }
  0x35   : > { %2517 = vmatmul.msk.f32.gmra.mxu3 %vm421_vm0, %v2909_v15  ;;  %1246 = vmatpush.msrb.mxu2 %v1173_v24 }
  0x3a   : > { %2482 = vmatmul.msk.f32.gmra.mxu0 %vm421_vm0, %v415_v30 }
  0x3b   : > { %2550 = vmatmul.msk.f32.gmra.mxu1 %vm421_vm0, %v554_v31 }
  0x3c   : > { %2496 = vmatmul.msk.f32.gmra.mxu2 %vm421_vm0, %v553_v29  ;;  %v1172_v29 = vld [vmem:[%s3864_s3 + $0x30] sm:$0xff] }
  0x3d   : > { %2518 = vmatmul.msk.f32.gmra.mxu3 %vm421_vm0, %v2922_v18  ;;  %1186 = vmatpush.msra.mxu1 %v1172_v29 }
  0x3e   : > { %1247 = vmatpush.msrb.mxu2 %v1172_v29 }
  0x3f   : > { %1187 = vmatpush.msra.mxu1 %v1171_v33 }
  0x40   : > { %1248 = vmatpush.msrb.mxu2 %v1171_v33 }
  0x42   : > { %2483 = vmatmul.msk.f32.gmra.mxu0 %vm421_vm0, %v416_v32 }
  0x43   : > { %2551 = vmatmul.msk.f32.gmra.mxu1 %vm421_vm0, %v555_v34 }
  0x44   : > { %2497 = vmatmul.msk.f32.gmra.mxu2 %vm421_vm0, %v554_v31 }
  0x45   : > { %2519 = vmatmul.msk.f32.gmra.mxu3 %vm421_vm0, %v2939_v22 }
  0x4a   : > { %2484 = vmatmul.msk.f32.gmra.mxu0 %vm421_vm0, %v417_v35 }
  0x4b   : > { %2552 = vmatmul.msk.f32.gmra.mxu1 %vm421_vm0, %v556_v37 }
  0x4c   : > { %2498 = vmatmul.msk.f32.gmra.mxu2 %vm421_vm0, %v555_v34 }
  0x4d   : > { %2520 = vmatmul.msk.f32.gmra.mxu3 %vm421_vm0, %v2510_v38 }
  0x52   : > { %2531 = vmatmul.msk.f32.vlgmr.msrb.gmra.mxu0 %vm421_vm0, %v2905_v13 }
  0x53   : > { %2553 = vmatmul.msk.f32.gmra.mxu1 %vm421_vm0, %v557_v40 }
  0x54   : > { %2499 = vmatmul.msk.f32.gmra.mxu2 %vm421_vm0, %v556_v37 }
  0x55   : > { %2585 = vmatmul.msk.f32.vlgmr.msrb.gmra.mxu3 %vm421_vm0, %v412_v16 }
  0x5a   : > { %2532 = vmatmul.msk.f32.gmra.mxu0 %vm421_vm0, %v412_v16 }
  0x5b   : > { %2554 = vmatmul.msk.f32.gmra.mxu1 %vm421_vm0, %v558_v41 }
  0x5c   : > { %2500 = vmatmul.msk.f32.gmra.mxu2 %vm421_vm0, %v557_v40 }
  0x5d   : > { %2586 = vmatmul.msk.f32.gmra.mxu3 %vm421_vm0, %v413_v20 }
  0x62   : > { %2533 = vmatmul.msk.f32.gmra.mxu0 %vm421_vm0, %v413_v20 }
  0x63   : > { %2555 = vmatmul.msk.f32.gmra.mxu1 %vm421_vm0, %v559_v42 }
  0x64   : > { %2501 = vmatmul.msk.f32.gmra.mxu2 %vm421_vm0, %v558_v41 }
  0x65   : > { %2587 = vmatmul.msk.f32.gmra.mxu3 %vm421_vm0, %v414_v25 }
  0x6a   : > { %2534 = vmatmul.msk.f32.gmra.mxu0 %vm421_vm0, %v414_v25 }
  0x6b   : > { %2556 = vmatmul.msk.f32.gmra.mxu1 %vm421_vm0, %v2546_v43 }
  0x6c   : > { %2502 = vmatmul.msk.f32.gmra.mxu2 %vm421_vm0, %v559_v42 }
  0x6d   : > { %2588 = vmatmul.msk.f32.gmra.mxu3 %vm421_vm0, %v415_v30 }
  0x72   : > { %2535 = vmatmul.msk.f32.gmra.mxu0 %vm421_vm0, %v415_v30 }
  0x74   : > { %2567 = vmatmul.msk.f32.vlgmr.msra.gmra.mxu2 %vm421_vm0, %v2919_v17 }
  0x75   : > { %2589 = vmatmul.msk.f32.gmra.mxu3 %vm421_vm0, %v416_v32 }
  0x7a   : > { %2536 = vmatmul.msk.f32.gmra.mxu0 %vm421_vm0, %v416_v32 }
  0x7c   : > { %2568 = vmatmul.msk.f32.gmra.mxu2 %vm421_vm0, %v2936_v21 }
  0x7d   : > { %2590 = vmatmul.msk.f32.gmra.mxu3 %vm421_vm0, %v417_v35 }
  0x82   : > { %2537 = vmatmul.msk.f32.gmra.mxu0 %vm421_vm0, %v417_v35 }
  0x84   : > { %2569 = vmatmul.msk.f32.gmra.mxu2 %vm421_vm0, %v2892_v10 }
  0x85   : > { %2591 = vmatmul.msk.f32.gmra.mxu3 %vm421_vm0, %v2528_v44 }
  0x8a   : > { %2538 = vmatmul.msk.f32.gmra.mxu0 %vm421_vm0, %v2528_v44 }
  0x8c   : > { %2570 = vmatmul.msk.f32.gmra.mxu2 %vm421_vm0, %v2909_v15 }
  0x8d   : > { %2592 = vmatmul.msk.f32.gmra.mxu3 %vm421_vm0, %v2582_v45 }
  0x8f   : > { %v3038_v46 = vpop.f32.mrf.mxu0 }
  0x90   : > { %v528_v5 = vpop.f32.mrf.mxu1 }
  0x91   : > { %v529_v24 = vadd.f32 %v528_v5, %v3038_v46 }
  0x92   : > { %2603 = vmatmul.msk.f32.vlgmr.msra.gmra.mxu0 %vm421_vm0, %v554_v31 }
  0x94   : > { %2571 = vmatmul.msk.f32.gmra.mxu2 %vm421_vm0, %v2922_v18 }
  0x97   : > { %v3044_v47 = vpop.f32.mrf.mxu2  ;;  %v3046_v48 = vpop.f32.mrf.mxu0 }
  0x98   : > { %v3064_v54 = vpop.f32.mrf.mxu3  ;;  %v531_v9 = vpop.f32.mrf.mxu1 }
  0x9a   : > { %2604 = vmatmul.msk.f32.gmra.mxu0 %vm421_vm0, %v555_v34 }
  0x9c   : > { %2572 = vmatmul.msk.f32.gmra.mxu2 %vm421_vm0, %v2939_v22 }
  0x9f   : > { %v3051_v49 = vpop.f32.mrf.mxu2  ;;  %v3053_v50 = vpop.f32.mrf.mxu0 }
  0xa0   : > { %v3075_v59 = vpop.f32.mrf.mxu3  ;;  %v534_v13 = vpop.f32.mrf.mxu1 }
  0xa1   : > { %v535_v33 = vadd.f32 %v534_v13, %v3053_v50 }
  0xa2   : > { %2605 = vmatmul.msk.f32.gmra.mxu0 %vm421_vm0, %v556_v37  ;;  %v1170_v37 = vld [vmem:[%s3864_s3 + $0x20] sm:$0xff] }
  0xa3   : > { %1188 = vmatpush.msra.mxu1 %v1170_v37  ;;  %1249 = vmatpush.msrb.mxu2 %v1170_v37 }
  0xa4   : > { %2573 = vmatmul.msk.f32.gmra.mxu2 %vm421_vm0, %v2510_v38 }
  0xa7   : > { %v3057_v51 = vpop.f32.mrf.mxu2  ;;  %v3059_v52 = vpop.f32.mrf.mxu0 }
  0xa8   : > { %v3082_v62 = vpop.f32.mrf.mxu3  ;;  %v537_v17 = vpop.f32.mrf.mxu1 }
  0xaa   : > { %2606 = vmatmul.msk.f32.gmra.mxu0 %vm421_vm0, %v557_v40 }
  0xac   : > { %2574 = vmatmul.msk.f32.gmra.mxu2 %vm421_vm0, %v2564_v53  ;;  %v1168_v53 = vld [vmem:[%s3864_s3 + $0x10] sm:$0xff] }
  0xaf   : > { %v3066_v55 = vpop.f32.mrf.mxu2  ;;  %v3068_v56 = vpop.f32.mrf.mxu0 }
  0xb0   : > { %v3091_v2 = vpop.f32.mrf.mxu3  ;;  %v3121_v21 = vpop.f32.mrf.mxu1 }
  0xb2   : > { %2607 = vmatmul.msk.f32.gmra.mxu0 %vm421_vm0, %v558_v41 }
  0xb7   : > { %v3071_v57 = vpop.f32.mrf.mxu2  ;;  %v3073_v58 = vpop.f32.mrf.mxu0 }
  0xb8   : > { %v3097_v6 = vpop.f32.mrf.mxu3  ;;  %v860_v27 = vpop.f32.mrf.mxu1  ;;  %v544_v50 = vadd.f32 %v3051_v49, %v3073_v58 }
  0xba   : > { %2608 = vmatmul.msk.f32.gmra.mxu0 %vm421_vm0, %v559_v42  ;;  %v1169_v42 = vld [vmem:[%s3864_s3 + $0x18] sm:$0xff] }
  0xbb   : > { %1189 = vmatpush.msra.mxu1 %v1169_v42  ;;  %1250 = vmatpush.msrb.mxu2 %v1169_v42  ;;  %v628_v42 = vadd.f32 %v3071_v57, %v529_v24 }
  0xbd   : > { %1190 = vmatpush.msra.mxu1 %v1168_v53  ;;  %1251 = vmatpush.msrb.mxu2 %v1168_v53 }
  0xbf   : > { %v3078_v60 = vpop.f32.mrf.mxu2  ;;  %v3080_v61 = vpop.f32.mrf.mxu0 }
  0xc0   : > { %v3105_v11 = vpop.f32.mrf.mxu3  ;;  %v863_v32 = vpop.f32.mrf.mxu1  ;;  %v547_v13 = vadd.f32 %v3057_v51, %v3080_v61 }
  0xc2   : > { %2609 = vmatmul.msk.f32.gmra.mxu0 %vm421_vm0, %v2546_v43 }
  0xc7   : > { %v3085_v63 = vpop.f32.mrf.mxu2  ;;  %v3087_v0 = vpop.f32.mrf.mxu0 }
  0xc8   : > { %v3113_v16 = vpop.f32.mrf.mxu3  ;;  %v866_v38 = vpop.f32.mrf.mxu1 }
  0xca   : > { %2610 = vmatmul.msk.f32.gmra.mxu0 %vm421_vm0, %v2600_v1  ;;  %v532_v1 = vadd.f32 %v531_v9, %v3046_v48  ;;  %v541_v48 = vadd.f32 %v3044_v47, %v3068_v56 }
  0xcc   : > { %v629_v37 = vadd.f32 %v3078_v60, %v532_v1  ;;  %v713_v60 = vadd.f32 %v3064_v54, %v628_v42 }
  0xce   : > { %v714_v46 = vadd.f32 %v3075_v59, %v629_v37 }
  0xcf   : > { %v3093_v3 = vpop.f32.mrf.mxu2  ;;  %v3095_v4 = vpop.f32.mrf.mxu0 }
  0xd0   : > { %v3119_v20 = vpop.f32.mrf.mxu3  ;;  %v869_v43 = vpop.f32.mrf.mxu1  ;;  %v797_v47 = vadd.f32 %v3095_v4, %v713_v60 }
  0xd7   : > { %v3099_v7 = vpop.f32.mrf.mxu2  ;;  %v3101_v8 = vpop.f32.mrf.mxu0 }
  0xd8   : > { %v3130_v25 = vpop.f32.mrf.mxu3 }
  0xdf   : > { %v3103_v10 = vpop.f32.mrf.mxu2  ;;  %v3107_v12 = vpop.f32.mrf.mxu0 }
  0xe0   : > { %v3139_v30 = vpop.f32.mrf.mxu3  ;;  %v633_v56 = vadd.f32 %v3103_v10, %v544_v50  ;;  %v550_v10 = vadd.f32 %v3066_v55, %v3087_v0  ;;  %v1166_v55 = vld [vmem:[%s3864_s3] sm:$0xff] }
  0xe2   : > { %v718_v51 = vadd.f32 %v3105_v11, %v633_v56 }
  0xe7   : > { %v3109_v14 = vpop.f32.mrf.mxu2  ;;  %v3111_v15 = vpop.f32.mrf.mxu0 }
  0xe8   : > { %v3148_v36 = vpop.f32.mrf.mxu3  ;;  %v634_v54 = vadd.f32 %v3109_v14, %v547_v13 }
  0xef   : > { %v3115_v18 = vpop.f32.mrf.mxu2  ;;  %v3117_v19 = vpop.f32.mrf.mxu0 }
  0xf0   : > { %v3155_v41 = vpop.f32.mrf.mxu3 }
  0xf1   : > { %3875 = vst [vmem:[#allocation5_spill] sm:$0xff] %v3155_v41  ;;  %v872_v41 = vpop.f32.mrf.mxu1 }
  0xf7   : > { %v3123_v22 = vpop.f32.mrf.mxu0  ;;  %v3125_v23 = vpop.f32.mrf.mxu2 }
  0xf8   : > { %v3167_v29 = vpop.f32.mrf.mxu3 }
  0xff   : > { %v3132_v26 = vpop.f32.mrf.mxu0  ;;  %v3134_v28 = vpop.f32.mrf.mxu2 }
 0x100   : > { %v1041_v58 = vpop.f32.mrf.mxu3 }
 0x107   : > { %v3141_v31 = vpop.f32.mrf.mxu0  ;;  %v948_v34 = vpop.f32.mrf.mxu2 }
 0x108   : > { %3873 = vst [vmem:[#allocation3_spill] sm:$0xff] %v3141_v31  ;;  %v1044_v53 = vpop.f32.mrf.mxu3 }
 0x10f   : > { %v3146_v35 = vpop.f32.mrf.mxu0  ;;  %v951_v39 = vpop.f32.mrf.mxu2 }
 0x110   : > { %3874 = vst [vmem:[#allocation4_spill] sm:$0xff] %v3146_v35  ;;  %v630_v35 = vadd.f32 %v3085_v63, %v535_v33  ;;  %v798_v63 = vadd.f32 %v3101_v8, %v714_v46 }
 0x112   : > { %v715_v9 = vadd.f32 %v3082_v62, %v630_v35 }
 0x114   : > { %v799_v49 = vadd.f32 %v3107_v12, %v715_v9  ;;  %v719_v12 = vadd.f32 %v3113_v16, %v634_v54 }
 0x116   : > { %v883_v61 = vadd.f32 %v863_v32, %v799_v49  ;;  %v803_v11 = vadd.f32 %v3132_v26, %v719_v12 }
 0x117   : > { %v3153_v40 = vpop.f32.mrf.mxu0  ;;  %v954_v45 = vpop.f32.mrf.mxu2  ;;  %v3878_v1 = vld [vmem:[#allocation4_spill] sm:$0xff] }
 0x118   : > { %v968_v35 = vadd.f32 %v948_v34, %v883_v61 }
 0x11a   : > { %v1052_v26 = vadd.f32 %v3148_v36, %v968_v35  ;;  %v3880_v36 = vld [vmem:[#allocation3_spill] sm:$0xff] }
 0x11f   : > { %v3160_v44 = vpop.f32.mrf.mxu0  ;;  %v957_v57 = vpop.f32.mrf.mxu2 }
 0x120   : > { %3876 = vst [vmem:[#allocation6_spill] sm:$0xff] %v3160_v44  ;;  %v538_v44 = vadd.f32 %v537_v17, %v3059_v52  ;;  %v632_v52 = vadd.f32 %v3099_v7, %v541_v48  ;;  %v882_v7 = vadd.f32 %v860_v27, %v798_v63  ;;  %v881_v17 = vadd.f32 %v3121_v21, %v797_v47  ;;  %v875_v27 = vpop.f32.mrf.mxu1 }
 0x121   : > { %v635_v21 = vadd.f32 %v3115_v18, %v550_v10 }
 0x122   : > { %v631_v5 = vadd.f32 %v3093_v3, %v538_v44  ;;  %v717_v62 = vadd.f32 %v3097_v6, %v632_v52  ;;  %v966_v14 = vadd.f32 %v3125_v23, %v881_v17  ;;  %v802_v6 = vadd.f32 %v3123_v22, %v718_v51 }
 0x123   : > { %v720_v44 = vadd.f32 %v3119_v20, %v635_v21 }
 0x124   : > { %v716_v59 = vadd.f32 %v3091_v2, %v631_v5  ;;  %v801_v4 = vadd.f32 %v3117_v19, %v717_v62  ;;  %v967_v2 = vadd.f32 %v3134_v28, %v882_v7  ;;  %v1167_v19 = vld [vmem:[%s3864_s3 + $0x8] sm:$0xff]  ;;  %v1050_v23 = vadd.f32 %v3130_v25, %v966_v14 }
 0x125   : > { %1191 = vmatpush.msra.mxu1 %v1167_v19  ;;  %1252 = vmatpush.msrb.mxu2 %v1167_v19  ;;  %v886_v18 = vadd.f32 %v872_v41, %v802_v6  ;;  %v2619_v19 = vld [vmem:[%s3863_s2 + $0x70] sm:$0xff] }
 0x126   : > { %v800_v8 = vadd.f32 %v3111_v15, %v716_v59  ;;  %v885_v0 = vadd.f32 %v869_v43, %v801_v4  ;;  %v1051_v16 = vadd.f32 %v3139_v30, %v967_v2  ;;  %v887_v43 = vadd.f32 %v875_v27, %v803_v11  ;;  %v3877_v30 = vld [vmem:[#allocation5_spill] sm:$0xff] }
 0x127   : > { %v3172_v31 = vpop.f32.mrf.mxu0  ;;  %v960_v32 = vpop.f32.mrf.mxu2  ;;  %1192 = vmatpush.msra.mxu1 %v1166_v55  ;;  %1253 = vmatpush.msrb.mxu2 %v1166_v55  ;;  %v3221_v24 = vadd.f32 %v3878_v1, %v1050_v23  ;;  %v971_v25 = vadd.f32 %v957_v57, %v886_v18  ;;  %v3879_v41 = vld [vmem:[#allocation6_spill] sm:$0xff]  ;;  %v2618_v23 = vld [vmem:[%s3863_s2 + $0x68] sm:$0xff] }
 0x128   : > { %v884_v15 = vadd.f32 %v866_v38, %v800_v8  ;;  %v970_v34 = vadd.f32 %v954_v45, %v885_v0  ;;  %v3216_v38 = vadd.f32 %v3153_v40, %v1051_v16  ;;  %v3224_v33 = vadd.f32 %v3879_v41, %v1052_v26  ;;  %v878_v48 = vpop.f32.mrf.mxu1 }
 0x129   : > { %v804_v45 = vadd.f32 %v3880_v36, %v720_v44  ;;  %v972_v20 = vadd.f32 %v960_v32, %v887_v43  ;;  %v1145_v46 = vsel %vm1144_vm1, %v3221_v24, 0.0  ;;  %v1055_v5 = vadd.f32 %v1041_v58, %v971_v25  ;;  %v1047_v58 = vpop.f32.mrf.mxu3  ;;  %v2620_v32 = vld [vmem:[%s3863_s2 + $0x78] sm:$0xff]  ;;  %v2617_v44 = vld [vmem:[%s3863_s2 + $0x60] sm:$0xff] }
 0x12a   : > { %v969_v22 = vadd.f32 %v951_v39, %v884_v15  ;;  %v1054_v40 = vadd.f32 %v3167_v29, %v970_v34  ;;  %v1146_v37 = vsel %vm1144_vm1, %v3216_v38, 0.0  ;;  %v1148_v50 = vsel %vm1144_vm1, %v3224_v33, 0.0  ;;  %1396 = vmatpush.msra.mxu3 %v2620_v32  ;;  %v2640_v32 = vld [vmem:[%s3863_s2 + $0x98] sm:$0xff] }
 0x12b   : > { %v1147_v57 = vadd.f32 %v1146_v37, %v1145_v46  ;;  %v888_v52 = vadd.f32 %v878_v48, %v804_v45  ;;  %v1056_v63 = vadd.f32 %v1044_v53, %v972_v20 }
 0x12c   : > { %v1053_v39 = vadd.f32 %v3877_v30, %v969_v22  ;;  %1397 = vmatpush.msra.mxu3 %v2619_v19  ;;  %v2660_v19 = vld [vmem:[%s3863_s2 + $0xf8] sm:$0xff] }
 0x12d   : > { %v1149_v47 = vadd.f32 %v1148_v50, %v1147_v57  ;;  %1633 = vmatpush.msrb.mxu0 %v2660_v19 }
 0x12e   : > { %v3231_v42 = vadd.f32 %v3172_v31, %v1053_v39  ;;  %1398 = vmatpush.msra.mxu3 %v2618_v23  ;;  %v2638_v23 = vld [vmem:[%s3863_s2 + $0x88] sm:$0xff] }
 0x12f   : > { %v1122_v3 = vpop.f32.mrf.mxu0  ;;  %v963_v9 = vpop.f32.mrf.mxu2 }
 0x130   : > { %v3237_v60 = vadd.f32 %v1122_v3, %v1054_v40  ;;  %v1150_v13 = vsel %vm1144_vm1, %v3231_v42, 0.0  ;;  %v973_v56 = vadd.f32 %v963_v9, %v888_v52  ;;  %1399 = vmatpush.msra.mxu3 %v2617_v44 }
 0x131   : > { %v1151_v54 = vadd.f32 %v1150_v13, %v1149_v47 }
 0x132   : > { %v1152_v59 = vsel %vm1144_vm1, %v3237_v60, 0.0  ;;  %v1057_v7 = vadd.f32 %v1047_v58, %v973_v56 }
 0x133   : > { %v1153_v62 = vadd.f32 %v1152_v59, %v1151_v54 }
 0x137   : > { %v1125_v28 = vpop.f32.mrf.mxu0 }
 0x138   : > { %v3241_v31 = vadd.f32 %v1125_v28, %v1055_v5 }
 0x13a   : > { %v1154_v3 = vsel %vm1144_vm1, %v3241_v31, 0.0 }
 0x13b   : > { %v1155_v17 = vadd.f32 %v1154_v3, %v1153_v62 }
 0x13f   : > { %v1128_v29 = vpop.f32.mrf.mxu0 }
 0x140   : > { %v3245_v49 = vadd.f32 %v1128_v29, %v1056_v63 }
 0x142   : > { %v1156_v8 = vsel %vm1144_vm1, %v3245_v49, 0.0 }
 0x143   : > { %v1157_v4 = vadd.f32 %v1156_v8, %v1155_v17  ;;  %v2644_v8 = vld [vmem:[%s3863_s2 + $0xb8] sm:$0xff]  ;;  %v1345_v17 = vld [vmem:[%s3863_s2 + $0x30] sm:$0xff] }
 0x144   : > { %1543 = vmatpush.msra.mxu2 %v2644_v8 }
 0x147   : > { %v1131_v51 = vpop.f32.mrf.mxu0 }
 0x148   : > { %v3251_v61 = vadd.f32 %v1131_v51, %v1057_v7  ;;  %v1346_v7 = vld [vmem:[%s3863_s2 + $0x38] sm:$0xff]  ;;  %v2643_v51 = vld [vmem:[%s3863_s2 + $0xb0] sm:$0xff] }
 0x149   : > { %1461 = vmatpush.msrb.mxu1 %v1346_v7  ;;  %1544 = vmatpush.msra.mxu2 %v2643_v51 }
 0x14a   : > { %v1158_v2 = vsel %vm1144_vm1, %v3251_v61, 0.0 }
 0x14b   : > { %v1159_v10 = vadd.f32 %v1158_v2, %v1157_v4  ;;  %1462 = vmatpush.msrb.mxu1 %v1345_v17  ;;  %v1344_v4 = vld [vmem:[%s3863_s2 + $0x28] sm:$0xff] }
 0x14c   : > { %v2642_v2 = vld [vmem:[%s3863_s2 + $0xa8] sm:$0xff] }
 0x14d   : > { %v1160_v12 = vrot.slane %v1159_v10, 4  ;;  %1463 = vmatpush.msrb.mxu1 %v1344_v4  ;;  %1545 = vmatpush.msra.mxu2 %v2642_v2 }
 0x14f   : > { %v1161_v14 = vadd.f32 %v1160_v12, %v1159_v10  ;;  %v2616_v10 = vld [vmem:[%s3863_s2 + $0x58] sm:$0xff]  ;;  %v1343_v12 = vld [vmem:[%s3863_s2 + $0x20] sm:$0xff] }
 0x150   : > { %1400 = vmatpush.msra.mxu3 %v2616_v10  ;;  %1464 = vmatpush.msrb.mxu1 %v1343_v12 }
 0x151   : > { %v1162_v6 = vrot.slane %v1161_v14, 2 }
 0x153   : > { %v1163_v27 = vadd.f32 %v1162_v6, %v1161_v14  ;;  %v2641_v14 = vld [vmem:[%s3863_s2 + $0xa0] sm:$0xff]  ;;  %v2788_v6 = vmov 0.0  }
 0x154   : > { %1301 = vst.msk [vmem:[#allocation2] sm:$0xff] %vm1144_vm1, %v2788_v6  ;;  %1546 = vmatpush.msra.mxu2 %v2641_v14 }
 0x155   : > { %v1164_v15 = vrot.slane %v1163_v27, 1  ;;  %1303 = vst.msk [vmem:[#allocation2 + $0x8] sm:$0x3] %vm1302_vm2, %v2788_v6 }
 0x156   : > { %1304 = vst.msk [vmem:[#allocation2 + $0x10] sm:$0xff] %vm1144_vm1, %v2788_v6  ;;  %1547 = vmatpush.msra.mxu2 %v2640_v32 }
 0x157   : > { %v1165_v35 = vadd.f32 %v1164_v15, %v1163_v27  ;;  %v2615_v27 = vld [vmem:[%s3863_s2 + $0x50] sm:$0xff]  ;;  %v2614_v15 = vld [vmem:[%s3863_s2 + $0x48] sm:$0xff]  ;;  %1305 = vst.msk [vmem:[#allocation2 + $0x18] sm:$0x3] %vm1302_vm2, %v2788_v6 }
 0x158   : > { %1401 = vmatpush.msra.mxu3 %v2615_v27  ;;  %1306 = vst.msk [vmem:[#allocation2 + $0x20] sm:$0xff] %vm1144_vm1, %v2788_v6 }
 0x159   : > { %2611 = vmatmul.msk.f32.vlgmr.msra.gmra.mxu1 %vm1144_vm1, %v1165_v35  ;;  %v2613_v35 = vld [vmem:[%s3863_s2 + $0x40] sm:$0xff]  ;;  %1307 = vst.msk [vmem:[#allocation2 + $0x28] sm:$0x3] %vm1302_vm2, %v2788_v6 }
 0x15a   : > { %1402 = vmatpush.msra.mxu3 %v2614_v15  ;;  %1308 = vst.msk [vmem:[#allocation2 + $0x30] sm:$0xff] %vm1144_vm1, %v2788_v6 }
 0x15b   : > { %1309 = vst.msk [vmem:[#allocation2 + $0x38] sm:$0x3] %vm1302_vm2, %v2788_v6 }
 0x15c   : > { %1403 = vmatpush.msra.mxu3 %v2613_v35  ;;  %1310 = vst.msk [vmem:[#allocation2 + $0x40] sm:$0xff] %vm1144_vm1, %v2788_v6 }
 0x15d   : > { %1311 = vst.msk [vmem:[#allocation2 + $0x48] sm:$0x3] %vm1302_vm2, %v2788_v6 }
 0x15e   : > { %1312 = vst.msk [vmem:[#allocation2 + $0x50] sm:$0xff] %vm1144_vm1, %v2788_v6 }
 0x15f   : > { %1313 = vst.msk [vmem:[#allocation2 + $0x58] sm:$0x3] %vm1302_vm2, %v2788_v6 }
 0x160   : > { %1314 = vst.msk [vmem:[#allocation2 + $0x60] sm:$0xff] %vm1144_vm1, %v2788_v6 }
 0x161   : > { %1315 = vst.msk [vmem:[#allocation2 + $0x68] sm:$0x3] %vm1302_vm2, %v2788_v6 }
 0x162   : > { %1316 = vst.msk [vmem:[#allocation2 + $0x70] sm:$0xff] %vm1144_vm1, %v2788_v6 }
 0x163   : > { %1317 = vst.msk [vmem:[#allocation2 + $0x78] sm:$0x3] %vm1302_vm2, %v2788_v6 }
 0x164   : > { %1318 = vst.msk [vmem:[#allocation2 + $0x80] sm:$0xff] %vm1144_vm1, %v2788_v6 }
 0x165   : > { %1319 = vst.msk [vmem:[#allocation2 + $0x88] sm:$0x3] %vm1302_vm2, %v2788_v6 }
 0x166   : > { %1320 = vst.msk [vmem:[#allocation2 + $0x90] sm:$0xff] %vm1144_vm1, %v2788_v6 }
 0x167   : > { %1321 = vst.msk [vmem:[#allocation2 + $0x98] sm:$0x3] %vm1302_vm2, %v2788_v6 }
 0x1d6   : > { %v3256_v21 = vpop.f32.mrf.mxu1 }
 0x1d7   : > { %v1197_v11 = vperm.slane %v3256_v21, 0 }
 0x1d9   : > { %v1198_v55 = vsub.f32 %v3221_v24, %v1197_v11  ;;  %v1199_v0 = vsub.f32 %v3216_v38, %v1197_v11  ;;  %v1200_v16 = vsub.f32 %v3224_v33, %v1197_v11  ;;  %v1201_v22 = vsub.f32 %v3231_v42, %v1197_v11 }
 0x1da   : > { %v1202_v18 = vsub.f32 %v3237_v60, %v1197_v11  ;;  %v1203_v43 = vsub.f32 %v3241_v31, %v1197_v11  ;;  %v1204_v25 = vsub.f32 %v3245_v49, %v1197_v11  ;;  %v1205_v40 = vsub.f32 %v3251_v61, %v1197_v11  ;;  %v1342_v11 = vld [vmem:[%s3863_s2 + $0x18] sm:$0xff] }
 0x1db   : > { %v1206_v28 = vmul.f32 %v1198_v55, %v1198_v55  ;;  %v1207_v26 = vmul.f32 %v1199_v0, %v1199_v0  ;;  %v1208_v34 = vmul.f32 %v1200_v16, %v1200_v16  ;;  %v1209_v53 = vmul.f32 %v1201_v22, %v1201_v22  ;;  %1465 = vmatpush.msrb.mxu1 %v1342_v11  ;;  %v1341_v55 = vld [vmem:[%s3863_s2 + $0x10] sm:$0xff]  ;;  %v1340_v22 = vld [vmem:[%s3863_s2 + $0x8] sm:$0xff] }
 0x1dc   : > { %v1210_v41 = vmul.f32 %v1202_v18, %v1202_v18  ;;  %v1211_v37 = vmul.f32 %v1203_v43, %v1203_v43  ;;  %v1212_v46 = vmul.f32 %v1204_v25, %v1204_v25  ;;  %v1213_v57 = vmul.f32 %v1205_v40, %v1205_v40  ;;  %v2639_v0 = vld [vmem:[%s3863_s2 + $0x90] sm:$0xff]  ;;  %v2658_v18 = vld [vmem:[%s3863_s2 + $0xe8] sm:$0xff]  ;;  %v2656_v25 = vld [vmem:[%s3863_s2 + $0xd8] sm:$0xff] }
 0x1dd   : > { %v1214_v30 = vsel %vm1144_vm1, %v1206_v28, 0.0  ;;  %v1215_v39 = vsel %vm1144_vm1, %v1207_v26, 0.0  ;;  %v1217_v36 = vsel %vm1144_vm1, %v1208_v34, 0.0  ;;  %v1219_v20 = vsel %vm1144_vm1, %v1209_v53, 0.0  ;;  %v2659_v16 = vld [vmem:[%s3863_s2 + $0xf0] sm:$0xff]  ;;  %1466 = vmatpush.msrb.mxu1 %v1341_v55  ;;  %1548 = vmatpush.msra.mxu2 %v2639_v0  ;;  %v1339_v26 = vld [vmem:[%s3863_s2] sm:$0xff] }
 0x1de   : > { %v1216_v1 = vadd.f32 %v1215_v39, %v1214_v30  ;;  %v1221_v5 = vsel %vm1144_vm1, %v1210_v41, 0.0  ;;  %v1223_v9 = vsel %vm1144_vm1, %v1211_v37, 0.0  ;;  %v1225_v52 = vsel %vm1144_vm1, %v1212_v46, 0.0  ;;  %1634 = vmatpush.msrb.mxu0 %v2659_v16  ;;  %v2637_v34 = vld [vmem:[%s3863_s2 + $0x80] sm:$0xff]  ;;  %v2655_v41 = vld [vmem:[%s3863_s2 + $0xd0] sm:$0xff] }
 0x1df   : > { %v1227_v13 = vsel %vm1144_vm1, %v1213_v57, 0.0  ;;  %1467 = vmatpush.msrb.mxu1 %v1340_v22  ;;  %1549 = vmatpush.msra.mxu2 %v2638_v23  ;;  %v1347_v43 = vld [vmem:[#allocation2 + $0x1] sm:$0xff]  ;;  %v2671_v55 = vld [vmem:[%s3863_s2 + $0x110] sm:$0xff] }
 0x1e0   : > { %v1218_v45 = vadd.f32 %v1217_v36, %v1216_v1  ;;  %v2657_v53 = vld [vmem:[%s3863_s2 + $0xe0] sm:$0xff]  ;;  %1635 = vmatpush.msrb.mxu0 %v2658_v18  ;;  %2621 = vmatmul.msk.f32.vlgmr.msra.gmra.mxu3 %vm1144_vm1, %v1347_v43  ;;  %v2676_v1 = vld [vmem:[%s3863_s2 + $0x138] sm:$0xff]  ;;  %v2654_v36 = vld [vmem:[%s3863_s2 + $0xc8] sm:$0xff] }
 0x1e1   : > { %v1331_v30 = vld [vmem:[#allocation2] sm:$0xff]  ;;  %1468 = vmatpush.msrb.mxu1 %v1339_v26  ;;  %1550 = vmatpush.msra.mxu2 %v2637_v34  ;;  %v2670_v23 = vld [vmem:[%s3863_s2 + $0x108] sm:$0xff]  ;;  %v2692_v18 = vld [vmem:[%s3863_s2 + $0x178] sm:$0xff] }
 0x1e2   : > { %v1220_v48 = vadd.f32 %v1219_v20, %v1218_v45  ;;  %v1494_v39 = vld [vmem:[#allocation2 + $0x2] sm:$0xff]  ;;  %1636 = vmatpush.msrb.mxu0 %v2657_v53  ;;  %2629 = vmatmul.msk.f32.vlgmr.msrb.gmra.mxu1 %vm1144_vm1, %v1331_v30  ;;  %v2675_v20 = vld [vmem:[%s3863_s2 + $0x130] sm:$0xff] }
 0x1e3   : > { %1723 = vmatpush.msrb.mxu3 %v2676_v1  ;;  %v2653_v40 = vld [vmem:[%s3863_s2 + $0xc0] sm:$0xff]  ;;  %1813 = vmatpush.msra.mxu1 %v2692_v18  ;;  %v2691_v26 = vld [vmem:[%s3863_s2 + $0x170] sm:$0xff]  ;;  %v2706_v43 = vld [vmem:[%s3863_s2 + $0x1a8] sm:$0xff] }
 0x1e4   : > { %v1222_v50 = vadd.f32 %v1221_v5, %v1220_v48  ;;  %1637 = vmatpush.msrb.mxu0 %v2656_v25  ;;  %v2707_v34 = vld [vmem:[%s3863_s2 + $0x1b0] sm:$0xff]  ;;  %v2705_v1 = vld [vmem:[%s3863_s2 + $0x1a0] sm:$0xff] }
 0x1e5   : > { %1724 = vmatpush.msrb.mxu3 %v2675_v20  ;;  %1814 = vmatpush.msra.mxu1 %v2691_v26  ;;  %v2703_v20 = vld [vmem:[%s3863_s2 + $0x190] sm:$0xff] }
 0x1e6   : > { %v1224_v29 = vadd.f32 %v1223_v9, %v1222_v50  ;;  %1638 = vmatpush.msrb.mxu0 %v2655_v41  ;;  %v1142_v50 = vld [vmem:[%s3865_s4] sm:$0x1]  ;;  %v2674_v9 = vld [vmem:[%s3863_s2 + $0x128] sm:$0xff] }
 0x1e7   : > { %1725 = vmatpush.msrb.mxu3 %v2674_v9  ;;  %v2669_v41 = vld [vmem:[%s3863_s2 + $0x100] sm:$0xff]  ;;  %v2702_v9 = vld [vmem:[%s3863_s2 + $0x188] sm:$0xff] }
 0x1e8   : > { %v1226_v63 = vadd.f32 %v1225_v52, %v1224_v29  ;;  %1639 = vmatpush.msrb.mxu0 %v2654_v36  ;;  %v2688_v36 = vld [vmem:[%s3863_s2 + $0x158] sm:$0xff] }
 0x1ea   : > { %v1228_v47 = vadd.f32 %v1227_v13, %v1226_v63  ;;  %1640 = vmatpush.msrb.mxu0 %v2653_v40  ;;  %v1143_v63 = vld [vmem:[%s3866_s5] sm:$0x1]  ;;  %v2724_v40 = vld [vmem:[%s3863_s2 + $0x1f8] sm:$0xff] }
 0x1ec   : > { %v1229_v56 = vrot.slane %v1228_v47, 4  ;;  %1994 = vmatpush.msra.mxu0 %v2724_v40 }
 0x1ee   : > { %v1230_v59 = vadd.f32 %v1229_v56, %v1228_v47 }
 0x1f0   : > { %v1231_v54 = vrot.slane %v1230_v59, 2 }
 0x1f2   : > { %v1232_v58 = vadd.f32 %v1231_v54, %v1230_v59  ;;  %v2673_v54 = vld [vmem:[%s3863_s2 + $0x120] sm:$0xff] }
 0x1f3   : > { %1726 = vmatpush.msrb.mxu3 %v2673_v54 }
 0x1f4   : > { %v1233_v3 = vrot.slane %v1232_v58, 1 }
 0x1f6   : > { %v1234_v62 = vadd.f32 %v1233_v3, %v1232_v58 }
 0x1f8   : > { %2612 = vmatmul.msk.f32.vlgmr.msrb.gmra.mxu2 %vm1144_vm1, %v1234_v62 }
 0x200   : > { %2645 = vmatmul.msk.f32.vlgmr.msra.gmra.mxu2 %vm1144_vm1, %v1494_v39  ;;  %v2689_v39 = vld [vmem:[%s3863_s2 + $0x160] sm:$0xff] }
 0x27b   : > { %v1255_v28 = vpop.f32.mrf.mxu2 }
 0x27c   : > { %v1256_v44 = vadd.f32 1e-05, %v1255_v28  ;;  %v2708_v28 = vld [vmem:[%s3863_s2 + $0x1b8] sm:$0xff] }
 0x27d   : > { %1904 = vmatpush.msrb.mxu2 %v2708_v28 }
 0x27e   : > { %2776 = vrsqrt.f32 %v1256_v44  ;;  %vm1264_vm4 = vweird.f32 %v1256_v44 }
 0x27f   : > { %1905 = vmatpush.msrb.mxu2 %v2707_v34 }
 0x281   : > { %1906 = vmatpush.msrb.mxu2 %v2706_v43 }
 0x283   : > { %1907 = vmatpush.msrb.mxu2 %v2705_v1 }
 0x284   : > { %v2777_v45 = vpop.eup %2776 }
 0x285   : > { %v1259_v37 = vmul.f32 %v2777_v45, %v1256_v44  ;;  %vm1265_vm3 = vweird.f32 %v2777_v45  ;;  %v2690_v44 = vld [vmem:[%s3863_s2 + $0x168] sm:$0xff] }
 0x286   : > { %vm1266_vm5 = vmor %vm1264_vm4, %vm1265_vm3  ;;  %1815 = vmatpush.msra.mxu1 %v2690_v44 }
 0x287   : > { %v1260_v48 = vmul.f32 %v2777_v45, %v1259_v37  ;;  %v2687_v37 = vld [vmem:[%s3863_s2 + $0x150] sm:$0xff] }
 0x288   : > { %1816 = vmatpush.msra.mxu1 %v2689_v39 }
 0x289   : > { %v1261_v46 = vmul.f32 0.5, %v1260_v48  ;;  %v2723_v48 = vld [vmem:[%s3863_s2 + $0x1f0] sm:$0xff] }
 0x28a   : > { %1817 = vmatpush.msra.mxu1 %v2688_v36  ;;  %1995 = vmatpush.msra.mxu0 %v2723_v48 }
 0x28b   : > { %v1262_v5 = vsub.f32 1.5, %v1261_v46  ;;  %v2722_v46 = vld [vmem:[%s3863_s2 + $0x1e8] sm:$0xff] }
 0x28c   : > { %1818 = vmatpush.msra.mxu1 %v2687_v37  ;;  %1996 = vmatpush.msra.mxu0 %v2722_v46 }
 0x28d   : > { %v1263_v57 = vmul.f32 %v2777_v45, %v1262_v5 }
 0x28f   : > { %v1267_v29 = vsel %vm1266_vm5, %v2777_v45, %v1263_v57  ;;  %v2704_v45 = vld [vmem:[%s3863_s2 + $0x198] sm:$0xff]  ;;  %v2686_v57 = vld [vmem:[%s3863_s2 + $0x148] sm:$0xff] }
 0x290   : > { %v1268_v52 = vmul.f32 %v1267_v29, %v1142_v50  ;;  %1908 = vmatpush.msrb.mxu2 %v2704_v45  ;;  %1819 = vmatpush.msra.mxu1 %v2686_v57 }
 0x292   : > { %v1269_v13 = vmul.f32 %v1268_v52, %v3256_v21  ;;  %v1272_v47 = vperm.slane %v1268_v52, 0  ;;  %1909 = vmatpush.msrb.mxu2 %v2703_v20  ;;  %v2721_v52 = vld [vmem:[%s3863_s2 + $0x1e0] sm:$0xff] }
 0x293   : > { %1997 = vmatpush.msra.mxu0 %v2721_v52 }
 0x294   : > { %v1270_v56 = vsub.f32 %v1143_v63, %v1269_v13  ;;  %v1274_v59 = vmul.f32 %v1272_v47, %v3221_v24  ;;  %v1275_v58 = vmul.f32 %v1272_v47, %v3216_v38  ;;  %v1276_v3 = vmul.f32 %v1272_v47, %v3224_v33  ;;  %v2685_v63 = vld [vmem:[%s3863_s2 + $0x140] sm:$0xff]  ;;  %1910 = vmatpush.msrb.mxu2 %v2702_v9 }
 0x295   : > { %v1277_v62 = vmul.f32 %v1272_v47, %v3231_v42  ;;  %v1278_v8 = vmul.f32 %v1272_v47, %v3237_v60  ;;  %v1279_v21 = vmul.f32 %v1272_v47, %v3241_v31  ;;  %v1280_v17 = vmul.f32 %v1272_v47, %v3245_v49  ;;  %v2672_v31 = vld [vmem:[%s3863_s2 + $0x118] sm:$0xff]  ;;  %v2701_v13 = vld [vmem:[%s3863_s2 + $0x180] sm:$0xff]  ;;  %1820 = vmatpush.msra.mxu1 %v2685_v63 }
 0x296   : > { %v1283_v7 = vperm.slane %v1270_v56, 0  ;;  %v1281_v10 = vmul.f32 %v1272_v47, %v3251_v61  ;;  %1727 = vmatpush.msrb.mxu3 %v2672_v31  ;;  %v2740_v47 = vld [vmem:[%s3863_s2 + $0x238] sm:$0xff]  ;;  %1911 = vmatpush.msrb.mxu2 %v2701_v13  ;;  %v1552_v31 = vpop.f32.mrf.mxu2 }
 0x297   : > { %v2720_v56 = vld [vmem:[%s3863_s2 + $0x1d8] sm:$0xff] }
 0x298   : > { %v1285_v51 = vadd.f32 %v1283_v7, %v1274_v59  ;;  %v1286_v24 = vadd.f32 %v1283_v7, %v1275_v58  ;;  %v1287_v4 = vadd.f32 %v1283_v7, %v1276_v3  ;;  %v1288_v2 = vadd.f32 %v1283_v7, %v1277_v62  ;;  %1728 = vmatpush.msrb.mxu3 %v2671_v55  ;;  %v2719_v59 = vld [vmem:[%s3863_s2 + $0x1d0] sm:$0xff]  ;;  %v2718_v3 = vld [vmem:[%s3863_s2 + $0x1c8] sm:$0xff] }
 0x299   : > { %v1289_v12 = vadd.f32 %v1283_v7, %v1278_v8  ;;  %v1290_v38 = vadd.f32 %v1283_v7, %v1279_v21  ;;  %v1291_v42 = vadd.f32 %v1283_v7, %v1280_v17  ;;  %v1292_v15 = vadd.f32 %v1283_v7, %v1281_v10  ;;  %1998 = vmatpush.msra.mxu0 %v2720_v56  ;;  %v2717_v7 = vld [vmem:[%s3863_s2 + $0x1c0] sm:$0xff]  ;;  %v2739_v8 = vld [vmem:[%s3863_s2 + $0x230] sm:$0xff] }
 0x29a   : > { %v1293_v14 = vmax.f32 %v1285_v51, 0.0  ;;  %v1294_v33 = vmax.f32 %v1286_v24, 0.0  ;;  %v1295_v6 = vmax.f32 %v1287_v4, 0.0  ;;  %v1296_v27 = vmax.f32 %v1288_v2, 0.0  ;;  %1729 = vmatpush.msrb.mxu3 %v2670_v23  ;;  %v2738_v24 = vld [vmem:[%s3863_s2 + $0x228] sm:$0xff] }
 0x29b   : > { %v1297_v60 = vmax.f32 %v1289_v12, 0.0  ;;  %v1298_v49 = vmax.f32 %v1290_v38, 0.0  ;;  %v1299_v61 = vmax.f32 %v1291_v42, 0.0  ;;  %v1300_v35 = vmax.f32 %v1292_v15, 0.0  ;;  %1999 = vmatpush.msra.mxu0 %v2719_v59  ;;  %v2737_v12 = vld [vmem:[%s3863_s2 + $0x220] sm:$0xff]  ;;  %v1405_v15 = vpop.f32.mrf.mxu3 }
 0x29c   : > { %1323 = vst.msk [vmem:[#allocation2 + $0x11] sm:$0xff] %vm1144_vm1, %v1293_v14  ;;  %1730 = vmatpush.msrb.mxu3 %v2669_v41  ;;  %v2736_v14 = vld [vmem:[%s3863_s2 + $0x218] sm:$0xff]  ;;  %v2733_v42 = vld [vmem:[%s3863_s2 + $0x200] sm:$0xff] }
 0x29d   : > { %1324 = vst.msk [vmem:[#allocation2 + $0x21] sm:$0xff] %vm1144_vm1, %v1294_v33  ;;  %2000 = vmatpush.msra.mxu0 %v2718_v3  ;;  %v2735_v33 = vld [vmem:[%s3863_s2 + $0x210] sm:$0xff] }
 0x29e   : > { %1325 = vst.msk [vmem:[#allocation2 + $0x31] sm:$0xff] %vm1144_vm1, %v1295_v6  ;;  %2084 = vmatpush.msra.mxu3 %v2740_v47  ;;  %v2734_v6 = vld [vmem:[%s3863_s2 + $0x208] sm:$0xff]  ;;  %v2042_v3 = vld [vmem:[#allocation2 + $0x92] sm:$0xff] }
 0x29f   : > { %1326 = vst.msk [vmem:[#allocation2 + $0x41] sm:$0xff] %vm1144_vm1, %v1296_v27  ;;  %2001 = vmatpush.msra.mxu0 %v2717_v7  ;;  %v1470_v27 = vpop.f32.mrf.mxu1 }
 0x2a0   : > { %1327 = vst.msk [vmem:[#allocation2 + $0x51] sm:$0xff] %vm1144_vm1, %v1297_v60  ;;  %2085 = vmatpush.msra.mxu3 %v2739_v8  ;;  %v1471_v60 = vadd.f32 %v1470_v27, %v1405_v15 }
 0x2a1   : > { %1328 = vst.msk [vmem:[#allocation2 + $0x61] sm:$0xff] %vm1144_vm1, %v1298_v49 }
 0x2a2   : > { %1329 = vst.msk [vmem:[#allocation2 + $0x71] sm:$0xff] %vm1144_vm1, %v1299_v61  ;;  %2086 = vmatpush.msra.mxu3 %v2738_v24  ;;  %v1576_v49 = vadd.f32 %v1552_v31, %v1471_v60  ;;  %v1862_v61 = vld [vmem:[#allocation2 + $0x90] sm:$0xff] }
 0x2a3   : > { %v3452_v11 = vld [vmem:[#allocation2 + $0x11] sm:$0xff]  ;;  %1330 = vst.msk [vmem:[#allocation2 + $0x81] sm:$0xff] %vm1144_vm1, %v1300_v35 }
 0x2a4   : > { %v1332_v32 = vld [vmem:[#allocation2 + $0x10] sm:$0xff]  ;;  %2622 = vmatmul.msk.f32.gmra.mxu3 %vm1144_vm1, %v3452_v11  ;;  %v3466_v0 = vld [vmem:[#allocation2 + $0x21] sm:$0xff] }
 0x2a5   : > { %v3454_v19 = vld [vmem:[#allocation2 + $0x12] sm:$0xff]  ;;  %2630 = vmatmul.msk.f32.gmra.mxu1 %vm1144_vm1, %v1332_v32  ;;  %2661 = vmatmul.msk.f32.vlgmr.msrb.gmra.mxu0 %vm1144_vm1, %v1332_v32  ;;  %v3468_v16 = vld [vmem:[#allocation2 + $0x20] sm:$0xff] }
 0x2a6   : > { %2646 = vmatmul.msk.f32.gmra.mxu2 %vm1144_vm1, %v3454_v19  ;;  %v3474_v22 = vld [vmem:[#allocation2 + $0x22] sm:$0xff]  ;;  %v3501_v53 = vld [vmem:[#allocation2 + $0x31] sm:$0xff]  ;;  %2087 = vmatpush.msra.mxu3 %v2737_v12 }
 0x2a7   : > { %v3503_v30 = vld [vmem:[#allocation2 + $0x30] sm:$0xff]  ;;  %v3545_v5 = vld [vmem:[#allocation2 + $0x41] sm:$0xff] }
 0x2a8   : > { %v3515_v25 = vld [vmem:[#allocation2 + $0x32] sm:$0xff]  ;;  %v3547_v50 = vld [vmem:[#allocation2 + $0x40] sm:$0xff]  ;;  %2088 = vmatpush.msra.mxu3 %v2736_v14 }
 0x2a9   : > { %v3559_v29 = vld [vmem:[#allocation2 + $0x42] sm:$0xff]  ;;  %v1352_v54 = vld [vmem:[#allocation2 + $0x51] sm:$0xff] }
 0x2aa   : > { %v1336_v58 = vld [vmem:[#allocation2 + $0x50] sm:$0xff]  ;;  %v1353_v21 = vld [vmem:[#allocation2 + $0x61] sm:$0xff]  ;;  %2089 = vmatpush.msra.mxu3 %v2735_v33 }
 0x2ab   : > { %v3588_v62 = vld [vmem:[#allocation2 + $0x52] sm:$0xff]  ;;  %v1337_v17 = vld [vmem:[#allocation2 + $0x60] sm:$0xff] }
 0x2ac   : > { %2623 = vmatmul.msk.f32.gmra.mxu3 %vm1144_vm1, %v3466_v0  ;;  %v3601_v51 = vld [vmem:[#allocation2 + $0x62] sm:$0xff]  ;;  %v1354_v4 = vld [vmem:[#allocation2 + $0x71] sm:$0xff] }
 0x2ad   : > { %2631 = vmatmul.msk.f32.gmra.mxu1 %vm1144_vm1, %v3468_v16  ;;  %2662 = vmatmul.msk.f32.gmra.mxu0 %vm1144_vm1, %v3468_v16  ;;  %v1338_v2 = vld [vmem:[#allocation2 + $0x70] sm:$0xff]  ;;  %v1591_v38 = vld [vmem:[#allocation2 + $0x80] sm:$0xff] }
 0x2ae   : > { %2647 = vmatmul.msk.f32.gmra.mxu2 %vm1144_vm1, %v3474_v22  ;;  %v3611_v10 = vld [vmem:[#allocation2 + $0x72] sm:$0xff]  ;;  %2090 = vmatpush.msra.mxu3 %v2734_v6  ;;  %v1681_v35 = vld [vmem:[#allocation2 + $0x81] sm:$0xff] }
 0x2af   : > { %v1952_v32 = vld [vmem:[#allocation2 + $0x91] sm:$0xff] }
 0x2b0   : > { %2091 = vmatpush.msra.mxu3 %v2733_v42 }
 0x2b4   : > { %2624 = vmatmul.msk.f32.gmra.mxu3 %vm1144_vm1, %v3501_v53 }
 0x2b5   : > { %2632 = vmatmul.msk.f32.gmra.mxu1 %vm1144_vm1, %v3503_v30  ;;  %2663 = vmatmul.msk.f32.gmra.mxu0 %vm1144_vm1, %v3503_v30 }
 0x2b6   : > { %2648 = vmatmul.msk.f32.gmra.mxu2 %vm1144_vm1, %v3515_v25 }
 0x2bc   : > { %2625 = vmatmul.msk.f32.gmra.mxu3 %vm1144_vm1, %v3545_v5 }
 0x2bd   : > { %2633 = vmatmul.msk.f32.gmra.mxu1 %vm1144_vm1, %v3547_v50  ;;  %2664 = vmatmul.msk.f32.gmra.mxu0 %vm1144_vm1, %v3547_v50 }
 0x2be   : > { %2649 = vmatmul.msk.f32.gmra.mxu2 %vm1144_vm1, %v3559_v29 }
 0x2c4   : > { %2626 = vmatmul.msk.f32.gmra.mxu3 %vm1144_vm1, %v1352_v54 }
 0x2c5   : > { %2634 = vmatmul.msk.f32.gmra.mxu1 %vm1144_vm1, %v1336_v58  ;;  %2665 = vmatmul.msk.f32.gmra.mxu0 %vm1144_vm1, %v1336_v58 }
 0x2c6   : > { %2650 = vmatmul.msk.f32.gmra.mxu2 %vm1144_vm1, %v3588_v62 }
 0x2cc   : > { %2627 = vmatmul.msk.f32.gmra.mxu3 %vm1144_vm1, %v1353_v21 }
 0x2cd   : > { %2635 = vmatmul.msk.f32.gmra.mxu1 %vm1144_vm1, %v1337_v17  ;;  %2666 = vmatmul.msk.f32.gmra.mxu0 %vm1144_vm1, %v1337_v17 }
 0x2ce   : > { %2651 = vmatmul.msk.f32.gmra.mxu2 %vm1144_vm1, %v3601_v51 }
 0x2d4   : > { %2628 = vmatmul.msk.f32.gmra.mxu3 %vm1144_vm1, %v1354_v4 }
 0x2d5   : > { %2636 = vmatmul.msk.f32.gmra.mxu1 %vm1144_vm1, %v1338_v2  ;;  %2667 = vmatmul.msk.f32.gmra.mxu0 %vm1144_vm1, %v1338_v2 }
 0x2d6   : > { %2652 = vmatmul.msk.f32.gmra.mxu2 %vm1144_vm1, %v3611_v10 }
 0x2dc   : > { %2677 = vmatmul.msk.f32.vlgmr.msrb.gmra.mxu3 %vm1144_vm1, %v3452_v11  ;;  %v1771_v11 = vld [vmem:[#allocation2 + $0x82] sm:$0xff] }
 0x2dd   : > { %2693 = vmatmul.msk.f32.vlgmr.msra.gmra.mxu1 %vm1144_vm1, %v3454_v19  ;;  %2668 = vmatmul.msk.f32.gmra.mxu0 %vm1144_vm1, %v1591_v38 }
 0x2de   : > { %2709 = vmatmul.msk.f32.vlgmr.msrb.gmra.mxu2 %vm1144_vm1, %v3468_v16 }
 0x2e4   : > { %2678 = vmatmul.msk.f32.gmra.mxu3 %vm1144_vm1, %v3466_v0 }
 0x2e5   : > { %2694 = vmatmul.msk.f32.gmra.mxu1 %vm1144_vm1, %v3474_v22  ;;  %2725 = vmatmul.msk.f32.vlgmr.msra.gmra.mxu0 %vm1144_vm1, %v3466_v0 }
 0x2e6   : > { %2710 = vmatmul.msk.f32.gmra.mxu2 %vm1144_vm1, %v3503_v30 }
 0x2ec   : > { %2679 = vmatmul.msk.f32.gmra.mxu3 %vm1144_vm1, %v3501_v53 }
 0x2ed   : > { %2695 = vmatmul.msk.f32.gmra.mxu1 %vm1144_vm1, %v3515_v25  ;;  %2726 = vmatmul.msk.f32.gmra.mxu0 %vm1144_vm1, %v3501_v53 }
 0x2ee   : > { %2711 = vmatmul.msk.f32.gmra.mxu2 %vm1144_vm1, %v3547_v50 }
 0x2f4   : > { %2680 = vmatmul.msk.f32.gmra.mxu3 %vm1144_vm1, %v3545_v5 }
 0x2f5   : > { %2696 = vmatmul.msk.f32.gmra.mxu1 %vm1144_vm1, %v3559_v29  ;;  %2727 = vmatmul.msk.f32.gmra.mxu0 %vm1144_vm1, %v3545_v5 }
 0x2f6   : > { %2712 = vmatmul.msk.f32.gmra.mxu2 %vm1144_vm1, %v1336_v58 }
 0x2fc   : > { %2681 = vmatmul.msk.f32.gmra.mxu3 %vm1144_vm1, %v1352_v54 }
 0x2fd   : > { %2697 = vmatmul.msk.f32.gmra.mxu1 %vm1144_vm1, %v3588_v62  ;;  %2728 = vmatmul.msk.f32.gmra.mxu0 %vm1144_vm1, %v1352_v54 }
 0x2fe   : > { %2713 = vmatmul.msk.f32.gmra.mxu2 %vm1144_vm1, %v1337_v17 }
 0x304   : > { %2682 = vmatmul.msk.f32.gmra.mxu3 %vm1144_vm1, %v1353_v21 }
 0x305   : > { %2698 = vmatmul.msk.f32.gmra.mxu1 %vm1144_vm1, %v3601_v51  ;;  %2729 = vmatmul.msk.f32.gmra.mxu0 %vm1144_vm1, %v1353_v21 }
 0x306   : > { %2714 = vmatmul.msk.f32.gmra.mxu2 %vm1144_vm1, %v1338_v2 }
 0x30c   : > { %2683 = vmatmul.msk.f32.gmra.mxu3 %vm1144_vm1, %v1354_v4 }
 0x30d   : > { %2699 = vmatmul.msk.f32.gmra.mxu1 %vm1144_vm1, %v3611_v10  ;;  %2730 = vmatmul.msk.f32.gmra.mxu0 %vm1144_vm1, %v1354_v4 }
 0x30e   : > { %2715 = vmatmul.msk.f32.gmra.mxu2 %vm1144_vm1, %v1591_v38 }
 0x314   : > { %2684 = vmatmul.msk.f32.gmra.mxu3 %vm1144_vm1, %v1681_v35 }
 0x315   : > { %2700 = vmatmul.msk.f32.gmra.mxu1 %vm1144_vm1, %v1771_v11  ;;  %2731 = vmatmul.msk.f32.gmra.mxu0 %vm1144_vm1, %v1681_v35 }
 0x316   : > { %2716 = vmatmul.msk.f32.gmra.mxu2 %vm1144_vm1, %v1862_v61  ;;  %v2155_v61 = vld [vmem:[%s3864_s3 + $0x38] sm:$0xff] }
 0x317   : > { %2167 = vmatpush.msrb.mxu1 %v2155_v61  ;;  %2228 = vmatpush.msra.mxu2 %v2155_v61 }
 0x31c   : > { %2741 = vmatmul.msk.f32.vlgmr.msra.gmra.mxu3 %vm1144_vm1, %v3474_v22 }
 0x31d   : > { %2732 = vmatmul.msk.f32.gmra.mxu0 %vm1144_vm1, %v1952_v32 }
 0x322   : > { %v1473_v19 = vpop.f32.mrf.mxu1  ;;  %v1642_v55 = vpop.f32.mrf.mxu0 }
 0x323   : > { %v1666_v0 = vadd.f32 %v1642_v55, %v1576_v49 }
 0x324   : > { %2742 = vmatmul.msk.f32.gmra.mxu3 %vm1144_vm1, %v3515_v25 }
 0x327   : > { %v1408_v16 = vpop.f32.mrf.mxu3 }
 0x328   : > { %v1474_v23 = vadd.f32 %v1473_v19, %v1408_v16  ;;  %v2154_v19 = vld [vmem:[%s3864_s3 + $0x30] sm:$0xff] }
 0x329   : > { %v1555_v18 = vpop.f32.mrf.mxu2  ;;  %2168 = vmatpush.msrb.mxu1 %v2154_v19  ;;  %2229 = vmatpush.msra.mxu2 %v2154_v19 }
 0x32a   : > { %v1476_v28 = vpop.f32.mrf.mxu1  ;;  %v1577_v26 = vadd.f32 %v1555_v18, %v1474_v23  ;;  %v1645_v34 = vpop.f32.mrf.mxu0  ;;  %v2153_v18 = vld [vmem:[%s3864_s3 + $0x28] sm:$0xff] }
 0x32b   : > { %2169 = vmatpush.msrb.mxu1 %v2153_v18  ;;  %2230 = vmatpush.msra.mxu2 %v2153_v18 }
 0x32c   : > { %v1667_v44 = vadd.f32 %v1645_v34, %v1577_v26  ;;  %2743 = vmatmul.msk.f32.gmra.mxu3 %vm1144_vm1, %v3559_v29 }
 0x32f   : > { %v1411_v43 = vpop.f32.mrf.mxu3 }
 0x330   : > { %v1477_v22 = vadd.f32 %v1476_v28, %v1411_v43 }
 0x331   : > { %v1558_v53 = vpop.f32.mrf.mxu2 }
 0x332   : > { %v1578_v30 = vadd.f32 %v1558_v53, %v1477_v22  ;;  %v1648_v39 = vpop.f32.mrf.mxu0  ;;  %v1479_v1 = vpop.f32.mrf.mxu1 }
 0x334   : > { %v1668_v41 = vadd.f32 %v1648_v39, %v1578_v30  ;;  %2744 = vmatmul.msk.f32.gmra.mxu3 %vm1144_vm1, %v3588_v62  ;;  %v2151_v30 = vld [vmem:[%s3864_s3 + $0x18] sm:$0xff] }
 0x337   : > { %v1414_v25 = vpop.f32.mrf.mxu3 }
 0x338   : > { %v1480_v36 = vadd.f32 %v1479_v1, %v1414_v25 }
 0x339   : > { %v1561_v45 = vpop.f32.mrf.mxu2 }
 0x33a   : > { %v1579_v40 = vadd.f32 %v1561_v45, %v1480_v36  ;;  %v1651_v37 = vpop.f32.mrf.mxu0  ;;  %v1482_v48 = vpop.f32.mrf.mxu1  ;;  %v2150_v36 = vld [vmem:[%s3864_s3 + $0x10] sm:$0xff] }
 0x33c   : > { %v1669_v20 = vadd.f32 %v1651_v37, %v1579_v40  ;;  %2745 = vmatmul.msk.f32.gmra.mxu3 %vm1144_vm1, %v3601_v51 }
 0x33f   : > { %v1417_v46 = vpop.f32.mrf.mxu3 }
 0x340   : > { %v1483_v5 = vadd.f32 %v1482_v48, %v1417_v46 }
 0x341   : > { %v1564_v50 = vpop.f32.mrf.mxu2 }
 0x342   : > { %v1580_v57 = vadd.f32 %v1564_v50, %v1483_v5  ;;  %v1654_v9 = vpop.f32.mrf.mxu0  ;;  %v1485_v52 = vpop.f32.mrf.mxu1 }
 0x344   : > { %v1670_v29 = vadd.f32 %v1654_v9, %v1580_v57  ;;  %2746 = vmatmul.msk.f32.gmra.mxu3 %vm1144_vm1, %v3611_v10 }
 0x347   : > { %v1420_v63 = vpop.f32.mrf.mxu3 }
 0x348   : > { %v1486_v13 = vadd.f32 %v1485_v52, %v1420_v63 }
 0x349   : > { %v1567_v47 = vpop.f32.mrf.mxu2 }
 0x34a   : > { %v1581_v56 = vadd.f32 %v1567_v47, %v1486_v13  ;;  %v1657_v59 = vpop.f32.mrf.mxu0  ;;  %v1488_v4 = vpop.f32.mrf.mxu1 }
 0x34c   : > { %v1671_v54 = vadd.f32 %v1657_v59, %v1581_v56  ;;  %2747 = vmatmul.msk.f32.gmra.mxu3 %vm1144_vm1, %v1771_v11 }
 0x34f   : > { %v1423_v58 = vpop.f32.mrf.mxu3 }
 0x351   : > { %v1570_v2 = vpop.f32.mrf.mxu2 }
 0x352   : > { %v1660_v38 = vpop.f32.mrf.mxu0  ;;  %v1491_v14 = vpop.f32.mrf.mxu1 }
 0x354   : > { %2748 = vmatmul.msk.f32.gmra.mxu3 %vm1144_vm1, %v2042_v3 }
 0x357   : > { %v3695_v62 = vpop.f32.mrf.mxu3 }
 0x358   : > { %v1492_v50 = vadd.f32 %v1491_v14, %v3695_v62 }
 0x359   : > { %v1573_v42 = vpop.f32.mrf.mxu2 }
 0x35a   : > { %v3697_v27 = vpop.f32.mrf.mxu0  ;;  %v1822_v15 = vpop.f32.mrf.mxu1  ;;  %v1583_v56 = vadd.f32 %v1573_v42, %v1492_v50 }
 0x35f   : > { %v1732_v7 = vpop.f32.mrf.mxu3 }
 0x360   : > { %v1756_v8 = vadd.f32 %v1732_v7, %v1666_v0 }
 0x361   : > { %v1913_v49 = vpop.f32.mrf.mxu2 }
 0x362   : > { %v2003_v35 = vpop.f32.mrf.mxu0  ;;  %v1825_v32 = vpop.f32.mrf.mxu1  ;;  %v1846_v57 = vadd.f32 %v1822_v15, %v1756_v8 }
 0x364   : > { %v1937_v59 = vadd.f32 %v1913_v49, %v1846_v57 }
 0x367   : > { %v1735_v21 = vpop.f32.mrf.mxu3 }
 0x368   : > { %v1757_v17 = vadd.f32 %v1735_v21, %v1667_v44  ;;  %v2152_v44 = vld [vmem:[%s3864_s3 + $0x20] sm:$0xff] }
 0x369   : > { %v1916_v55 = vpop.f32.mrf.mxu2  ;;  %2170 = vmatpush.msrb.mxu1 %v2152_v44  ;;  %2231 = vmatpush.msra.mxu2 %v2152_v44 }
 0x36a   : > { %v2006_v16 = vpop.f32.mrf.mxu0  ;;  %v1828_v23 = vpop.f32.mrf.mxu1  ;;  %v1847_v5 = vadd.f32 %v1825_v32, %v1757_v17  ;;  %v1673_v17 = vadd.f32 %v3697_v27, %v1583_v56 }
 0x36b   : > { %2171 = vmatpush.msrb.mxu1 %v2151_v30  ;;  %2232 = vmatpush.msra.mxu2 %v2151_v30 }
 0x36c   : > { %v1938_v47 = vadd.f32 %v1916_v55, %v1847_v5 }
 0x36d   : > { %2172 = vmatpush.msrb.mxu1 %v2150_v36  ;;  %2233 = vmatpush.msra.mxu2 %v2150_v36 }
 0x36f   : > { %v1738_v51 = vpop.f32.mrf.mxu3 }
 0x370   : > { %v1758_v24 = vadd.f32 %v1738_v51, %v1668_v41 }
 0x371   : > { %v1919_v28 = vpop.f32.mrf.mxu2 }
 0x372   : > { %v2009_v34 = vpop.f32.mrf.mxu0  ;;  %v1831_v43 = vpop.f32.mrf.mxu1  ;;  %v1848_v9 = vadd.f32 %v1828_v23, %v1758_v24 }
 0x377   : > { %v1741_v10 = vpop.f32.mrf.mxu3 }
 0x378   : > { %v1759_v12 = vadd.f32 %v1741_v10, %v1669_v20  ;;  %v1489_v20 = vadd.f32 %v1488_v4, %v1423_v58  ;;  %v2028_v4 = vadd.f32 %v2006_v16, %v1938_v47  ;;  %v2149_v10 = vld [vmem:[%s3864_s3 + $0x8] sm:$0xff] }
 0x379   : > { %v1922_v53 = vpop.f32.mrf.mxu2  ;;  %2173 = vmatpush.msrb.mxu1 %v2149_v10  ;;  %2234 = vmatpush.msra.mxu2 %v2149_v10 }
 0x37a   : > { %v2012_v39 = vpop.f32.mrf.mxu0  ;;  %v1834_v1 = vpop.f32.mrf.mxu1  ;;  %v1582_v46 = vadd.f32 %v1570_v2, %v1489_v20  ;;  %v1849_v52 = vadd.f32 %v1831_v43, %v1759_v12  ;;  %v2027_v2 = vadd.f32 %v2003_v35, %v1937_v59  ;;  %v2148_v12 = vld [vmem:[%s3864_s3] sm:$0xff] }
 0x37b   : > { %2174 = vmatpush.msrb.mxu1 %v2148_v12  ;;  %2235 = vmatpush.msra.mxu2 %v2148_v12 }
 0x37c   : > { %v1672_v13 = vadd.f32 %v1660_v38, %v1582_v46  ;;  %v1940_v51 = vadd.f32 %v1922_v53, %v1849_v52 }
 0x37f   : > { %v1744_v33 = vpop.f32.mrf.mxu3 }
 0x380   : > { %v1760_v6 = vadd.f32 %v1744_v33, %v1670_v29 }
 0x381   : > { %v1925_v25 = vpop.f32.mrf.mxu2 }
 0x382   : > { %v2015_v45 = vpop.f32.mrf.mxu0  ;;  %v1837_v37 = vpop.f32.mrf.mxu1  ;;  %v1850_v7 = vadd.f32 %v1834_v1, %v1760_v6  ;;  %v2030_v6 = vadd.f32 %v2012_v39, %v1940_v51 }
 0x384   : > { %v1941_v38 = vadd.f32 %v1925_v25, %v1850_v7 }
 0x386   : > { %v2031_v49 = vadd.f32 %v2015_v45, %v1941_v38 }
 0x387   : > { %v1747_v60 = vpop.f32.mrf.mxu3 }
 0x388   : > { %v1761_v31 = vadd.f32 %v1747_v60, %v1671_v54  ;;  %v1939_v54 = vadd.f32 %v1919_v28, %v1848_v9 }
 0x389   : > { %v1928_v48 = vpop.f32.mrf.mxu2 }
 0x38a   : > { %v2018_v63 = vpop.f32.mrf.mxu0  ;;  %v1840_v3 = vpop.f32.mrf.mxu1  ;;  %v1851_v58 = vadd.f32 %v1837_v37, %v1761_v31  ;;  %v2029_v62 = vadd.f32 %v2009_v34, %v1939_v54 }
 0x38c   : > { %v1942_v42 = vadd.f32 %v1928_v48, %v1851_v58 }
 0x38e   : > { %v2032_v32 = vadd.f32 %v2018_v63, %v1942_v42 }
 0x38f   : > { %v1750_v11 = vpop.f32.mrf.mxu3 }
 0x390   : > { %v1762_v21 = vadd.f32 %v1750_v11, %v1672_v13 }
 0x391   : > { %v1931_v8 = vpop.f32.mrf.mxu2 }
 0x392   : > { %v1852_v14 = vadd.f32 %v1840_v3, %v1762_v21  ;;  %v2021_v31 = vpop.f32.mrf.mxu0  ;;  %v1843_v19 = vpop.f32.mrf.mxu1 }
 0x394   : > { %v1943_v61 = vadd.f32 %v1931_v8, %v1852_v14 }
 0x396   : > { %v2033_v34 = vadd.f32 %v2021_v31, %v1943_v61 }
 0x397   : > { %v3705_v0 = vpop.f32.mrf.mxu3 }
 0x398   : > { %v1763_v27 = vadd.f32 %v3705_v0, %v1673_v17 }
 0x399   : > { %v1934_v18 = vpop.f32.mrf.mxu2 }
 0x39a   : > { %v1853_v55 = vadd.f32 %v1843_v19, %v1763_v27  ;;  %v2024_v1 = vpop.f32.mrf.mxu0 }
 0x39c   : > { %v1944_v53 = vadd.f32 %v1934_v18, %v1853_v55 }
 0x39e   : > { %v2034_v45 = vadd.f32 %v2024_v1, %v1944_v53  ;;  %v2298_v1 = vld [vmem:[%s3869_s8 + $0x38] sm:$0xff] }
 0x39f   : > { %v2093_v26 = vpop.f32.mrf.mxu3  ;;  %2335 = vmatpush.msra.mxu1 %v2298_v1 }
 0x3a0   : > { %v3730_v15 = vadd.f32 %v2093_v26, %v2027_v2 }
 0x3a2   : > { %v2127_v0 = vsel %vm1144_vm1, %v3730_v15, 0.0 }
 0x3a7   : > { %v2096_v22 = vpop.f32.mrf.mxu3 }
 0x3a8   : > { %v3727_v33 = vadd.f32 %v2096_v22, %v2028_v4 }
 0x3aa   : > { %v2128_v35 = vsel %vm1144_vm1, %v3727_v33, 0.0 }
 0x3ab   : > { %v2129_v28 = vadd.f32 %v2128_v35, %v2127_v0 }
 0x3af   : > { %v2099_v41 = vpop.f32.mrf.mxu3 }
 0x3b0   : > { %v3732_v60 = vadd.f32 %v2099_v41, %v2029_v62 }
 0x3b2   : > { %v2130_v16 = vsel %vm1144_vm1, %v3732_v60, 0.0 }
 0x3b3   : > { %v2131_v22 = vadd.f32 %v2130_v16, %v2129_v28 }
 0x3b7   : > { %v2102_v40 = vpop.f32.mrf.mxu3 }
 0x3b8   : > { %v3736_v11 = vadd.f32 %v2102_v40, %v2030_v6 }
 0x3ba   : > { %v2132_v44 = vsel %vm1144_vm1, %v3736_v11, 0.0 }
 0x3bb   : > { %v2133_v41 = vadd.f32 %v2132_v44, %v2131_v22 }
 0x3bf   : > { %v2105_v29 = vpop.f32.mrf.mxu3 }
 0x3c0   : > { %v3742_v23 = vadd.f32 %v2105_v29, %v2031_v49 }
 0x3c2   : > { %v2134_v30 = vsel %vm1144_vm1, %v3742_v23, 0.0 }
 0x3c3   : > { %v2135_v36 = vadd.f32 %v2134_v30, %v2133_v41  ;;  %v2297_v41 = vld [vmem:[%s3869_s8 + $0x30] sm:$0xff] }
 0x3c4   : > { %2336 = vmatpush.msra.mxu1 %v2297_v41 }
 0x3c7   : > { %v2108_v24 = vpop.f32.mrf.mxu3 }
 0x3c8   : > { %v3746_v43 = vadd.f32 %v2108_v24, %v2032_v32 }
 0x3ca   : > { %v2136_v25 = vsel %vm1144_vm1, %v3746_v43, 0.0 }
 0x3cb   : > { %v2137_v37 = vadd.f32 %v2136_v25, %v2135_v36  ;;  %v2296_v25 = vld [vmem:[%s3869_s8 + $0x28] sm:$0xff]  ;;  %v2295_v36 = vld [vmem:[%s3869_s8 + $0x20] sm:$0xff] }
 0x3cc   : > { %2337 = vmatpush.msra.mxu1 %v2296_v25 }
 0x3ce   : > { %2338 = vmatpush.msra.mxu1 %v2295_v36 }
 0x3cf   : > { %v2111_v26 = vpop.f32.mrf.mxu3 }
 0x3d0   : > { %v3750_v39 = vadd.f32 %v2111_v26, %v2033_v34 }
 0x3d2   : > { %v2138_v40 = vsel %vm1144_vm1, %v3750_v39, 0.0 }
 0x3d3   : > { %v2139_v46 = vadd.f32 %v2138_v40, %v2137_v37 }
 0x3d7   : > { %v2114_v20 = vpop.f32.mrf.mxu3 }
 0x3d8   : > { %v3756_v48 = vadd.f32 %v2114_v20, %v2034_v45  ;;  %v2294_v45 = vld [vmem:[%s3869_s8 + $0x18] sm:$0xff]  ;;  %v2293_v20 = vld [vmem:[%s3869_s8 + $0x10] sm:$0xff] }
 0x3d9   : > { %2339 = vmatpush.msra.mxu1 %v2294_v45 }
 0x3da   : > { %v2140_v5 = vsel %vm1144_vm1, %v3756_v48, 0.0 }
 0x3db   : > { %v2141_v50 = vadd.f32 %v2140_v5, %v2139_v46  ;;  %v2292_v46 = vld [vmem:[%s3869_s8 + $0x8] sm:$0xff]  ;;  %2340 = vmatpush.msra.mxu1 %v2293_v20  ;;  %v2291_v5 = vld [vmem:[%s3869_s8] sm:$0xff] }
 0x3dd   : > { %v2142_v57 = vrot.slane %v2141_v50, 4  ;;  %2341 = vmatpush.msra.mxu1 %v2292_v46 }
 0x3df   : > { %v2143_v9 = vadd.f32 %v2142_v57, %v2141_v50  ;;  %2342 = vmatpush.msra.mxu1 %v2291_v5 }
 0x3e1   : > { %v2144_v29 = vrot.slane %v2143_v9, 2 }
 0x3e3   : > { %v2145_v52 = vadd.f32 %v2144_v29, %v2143_v9 }
 0x3e5   : > { %v2146_v63 = vrot.slane %v2145_v52, 1 }
 0x3e7   : > { %v2147_v13 = vadd.f32 %v2146_v63, %v2145_v52  ;;  %v2125_v63 = vld [vmem:[%s3867_s6] sm:$0x1] }
 0x3e9   : > { %2749 = vmatmul.msk.f32.vlgmr.msrb.gmra.mxu1 %vm1144_vm1, %v2147_v13 }
 0x466   : > { %v3761_v47 = vpop.f32.mrf.mxu1 }
 0x467   : > { %v2179_v56 = vperm.slane %v3761_v47, 0 }
 0x469   : > { %v2180_v59 = vsub.f32 %v3730_v15, %v2179_v56  ;;  %v2181_v54 = vsub.f32 %v3727_v33, %v2179_v56  ;;  %v2182_v3 = vsub.f32 %v3732_v60, %v2179_v56  ;;  %v2183_v7 = vsub.f32 %v3736_v11, %v2179_v56 }
 0x46a   : > { %v2184_v4 = vsub.f32 %v3742_v23, %v2179_v56  ;;  %v2185_v8 = vsub.f32 %v3746_v43, %v2179_v56  ;;  %v2186_v10 = vsub.f32 %v3750_v39, %v2179_v56  ;;  %v2187_v6 = vsub.f32 %v3756_v48, %v2179_v56 }
 0x46b   : > { %v2188_v21 = vmul.f32 %v2180_v59, %v2180_v59  ;;  %v2189_v51 = vmul.f32 %v2181_v54, %v2181_v54  ;;  %v2190_v58 = vmul.f32 %v2182_v3, %v2182_v3  ;;  %v2191_v17 = vmul.f32 %v2183_v7, %v2183_v7  ;;  %v2126_v54 = vld [vmem:[%s3868_s7] sm:$0x1] }
 0x46c   : > { %v2192_v12 = vmul.f32 %v2184_v4, %v2184_v4  ;;  %v2193_v42 = vmul.f32 %v2185_v8, %v2185_v8  ;;  %v2194_v49 = vmul.f32 %v2186_v10, %v2186_v10  ;;  %v2195_v32 = vmul.f32 %v2187_v6, %v2187_v6 }
 0x46d   : > { %v2196_v2 = vsel %vm1144_vm1, %v2188_v21, 0.0  ;;  %v2197_v62 = vsel %vm1144_vm1, %v2189_v51, 0.0  ;;  %v2199_v38 = vsel %vm1144_vm1, %v2190_v58, 0.0  ;;  %v2201_v27 = vsel %vm1144_vm1, %v2191_v17, 0.0 }
 0x46e   : > { %v2198_v24 = vadd.f32 %v2197_v62, %v2196_v2  ;;  %v2203_v61 = vsel %vm1144_vm1, %v2192_v12, 0.0  ;;  %v2205_v19 = vsel %vm1144_vm1, %v2193_v42, 0.0  ;;  %v2207_v0 = vsel %vm1144_vm1, %v2194_v49, 0.0  ;;  %v2775_v49 = vld [vmem:[%s3870_s9] ss:$0 sm:$0xff] }
 0x46f   : > { %v2209_v18 = vsel %vm1144_vm1, %v2195_v32, 0.0 }
 0x470   : > { %v2200_v14 = vadd.f32 %v2199_v38, %v2198_v24 }
 0x472   : > { %v2202_v31 = vadd.f32 %v2201_v27, %v2200_v14 }
 0x474   : > { %v2204_v35 = vadd.f32 %v2203_v61, %v2202_v31 }
 0x476   : > { %v2206_v55 = vadd.f32 %v2205_v19, %v2204_v35 }
 0x478   : > { %v2208_v16 = vadd.f32 %v2207_v0, %v2206_v55 }
 0x47a   : > { %v2210_v28 = vadd.f32 %v2209_v18, %v2208_v16 }
 0x47c   : > { %v2211_v26 = vrot.slane %v2210_v28, 4 }
 0x47e   : > { %v2212_v34 = vadd.f32 %v2211_v26, %v2210_v28 }
 0x480   : > { %v2213_v44 = vrot.slane %v2212_v34, 2 }
 0x482   : > { %v2214_v22 = vadd.f32 %v2213_v44, %v2212_v34 }
 0x484   : > { %v2215_v53 = vrot.slane %v2214_v22, 1 }
 0x486   : > { %v2216_v30 = vadd.f32 %v2215_v53, %v2214_v22 }
 0x488   : > { %2750 = vmatmul.msk.f32.vlgmr.msra.gmra.mxu2 %vm1144_vm1, %v2216_v30 }
 0x50b   : > { %v2237_v40 = vpop.f32.mrf.mxu2 }
 0x50c   : > { %v2238_v37 = vadd.f32 1e-05, %v2237_v40 }
 0x50e   : > { %2778 = vrsqrt.f32 %v2238_v37  ;;  %vm2246_vm7 = vweird.f32 %v2238_v37 }
 0x514   : > { %v2779_v50 = vpop.eup %2778 }
 0x515   : > { %v2241_v57 = vmul.f32 %v2779_v50, %v2238_v37  ;;  %vm2247_vm6 = vweird.f32 %v2779_v50 }
 0x516   : > { %vm2248_vm8 = vmor %vm2246_vm7, %vm2247_vm6 }
 0x517   : > { %v2242_v9 = vmul.f32 %v2779_v50, %v2241_v57 }
 0x519   : > { %v2243_v29 = vmul.f32 0.5, %v2242_v9 }
 0x51b   : > { %v2244_v52 = vsub.f32 1.5, %v2243_v29 }
 0x51d   : > { %v2245_v13 = vmul.f32 %v2779_v50, %v2244_v52 }
 0x51f   : > { %v2249_v56 = vsel %vm2248_vm8, %v2779_v50, %v2245_v13 }
 0x520   : > { %v2250_v59 = vmul.f32 %v2249_v56, %v2125_v63 }
 0x522   : > { %v2251_v3 = vmul.f32 %v2250_v59, %v3761_v47  ;;  %v2254_v7 = vperm.slane %v2250_v59, 0 }
 0x524   : > { %v2252_v21 = vsub.f32 %v2126_v54, %v2251_v3  ;;  %v2256_v51 = vmul.f32 %v2254_v7, %v3730_v15  ;;  %v2257_v4 = vmul.f32 %v2254_v7, %v3727_v33  ;;  %v2258_v17 = vmul.f32 %v2254_v7, %v3732_v60 }
 0x525   : > { %v2259_v2 = vmul.f32 %v2254_v7, %v3736_v11  ;;  %v2260_v62 = vmul.f32 %v2254_v7, %v3742_v23  ;;  %v2261_v8 = vmul.f32 %v2254_v7, %v3746_v43  ;;  %v2262_v24 = vmul.f32 %v2254_v7, %v3750_v39 }
 0x526   : > { %v2265_v58 = vperm.slane %v2252_v21, 0  ;;  %v2263_v60 = vmul.f32 %v2254_v7, %v3756_v48 }
 0x528   : > { %v2267_v47 = vadd.f32 %v2265_v58, %v2256_v51  ;;  %v2268_v10 = vadd.f32 %v2265_v58, %v2257_v4  ;;  %v2269_v12 = vadd.f32 %v2265_v58, %v2258_v17  ;;  %v2270_v38 = vadd.f32 %v2265_v58, %v2259_v2 }
 0x529   : > { %v2271_v33 = vadd.f32 %v2265_v58, %v2260_v62  ;;  %v2272_v15 = vadd.f32 %v2265_v58, %v2261_v8  ;;  %v2273_v6 = vadd.f32 %v2265_v58, %v2262_v24  ;;  %v2274_v42 = vadd.f32 %v2265_v58, %v2263_v60 }
 0x52a   : > { %v2275_v11 = vmax.f32 %v2267_v47, 0.0  ;;  %v2276_v14 = vmax.f32 %v2268_v10, 0.0  ;;  %v2277_v23 = vmax.f32 %v2269_v12, 0.0  ;;  %v2278_v43 = vmax.f32 %v2270_v38, 0.0 }
 0x52b   : > { %v2279_v39 = vmax.f32 %v2271_v33, 0.0  ;;  %v2280_v27 = vmax.f32 %v2272_v15, 0.0  ;;  %v2281_v31 = vmax.f32 %v2273_v6, 0.0  ;;  %v2282_v48 = vmax.f32 %v2274_v42, 0.0 }
 0x52c   : > { %2283 = vst.msk [vmem:[%s394_s25] sm:$0xff] %vm1144_vm1, %v2275_v11  ;;  %2751 = vmatmul.msk.f32.vlgmr.msra.gmra.mxu1 %vm1144_vm1, %v2275_v11 }
 0x52d   : > { %2284 = vst.msk [vmem:[%s394_s25 + $0x8] sm:$0xff] %vm1144_vm1, %v2276_v14 }
 0x52e   : > { %2285 = vst.msk [vmem:[%s394_s25 + $0x10] sm:$0xff] %vm1144_vm1, %v2277_v23 }
 0x52f   : > { %2286 = vst.msk [vmem:[%s394_s25 + $0x18] sm:$0xff] %vm1144_vm1, %v2278_v43 }
 0x530   : > { %2287 = vst.msk [vmem:[%s394_s25 + $0x20] sm:$0xff] %vm1144_vm1, %v2279_v39 }
 0x531   : > { %2288 = vst.msk [vmem:[%s394_s25 + $0x28] sm:$0xff] %vm1144_vm1, %v2280_v27 }
 0x532   : > { %2289 = vst.msk [vmem:[%s394_s25 + $0x30] sm:$0xff] %vm1144_vm1, %v2281_v31 }
 0x533   : > { %2290 = vst.msk [vmem:[%s394_s25 + $0x38] sm:$0xff] %vm1144_vm1, %v2282_v48 }
 0x534   : > { %2752 = vmatmul.msk.f32.gmra.mxu1 %vm1144_vm1, %v2276_v14 }
 0x53c   : > { %2753 = vmatmul.msk.f32.gmra.mxu1 %vm1144_vm1, %v2277_v23 }
 0x544   : > { %2754 = vmatmul.msk.f32.gmra.mxu1 %vm1144_vm1, %v2278_v43 }
 0x54c   : > { %2755 = vmatmul.msk.f32.gmra.mxu1 %vm1144_vm1, %v2279_v39 }
 0x554   : > { %2756 = vmatmul.msk.f32.gmra.mxu1 %vm1144_vm1, %v2280_v27 }
 0x55c   : > { %2757 = vmatmul.msk.f32.gmra.mxu1 %vm1144_vm1, %v2281_v31 }
 0x564   : > { %2758 = vmatmul.msk.f32.gmra.mxu1 %vm1144_vm1, %v2282_v48 }
 0x5a9   : > { %v2344_v61 = vpop.f32.mrf.mxu1 }
 0x5aa   : > { %v2345_v35 = vadd.f32 %v2775_v49, %v2344_v61 }
 0x5ac   : > { %2369 = vst.msk [vmem:[%s399_s29] sm:$0xff] %vm2368_vm9, %v2345_v35 }
 0x5b1   : > { %v2347_v32 = vpop.f32.mrf.mxu1 }
 0x5b2   : > { %v2348_v19 = vadd.f32 %v2775_v49, %v2347_v32 }
 0x5b4   : > { %2370 = vst.msk [vmem:[%s399_s29 + $0x8] sm:$0xff] %vm2368_vm9, %v2348_v19 }
 0x5b9   : > { %v2350_v55 = vpop.f32.mrf.mxu1 }
 0x5ba   : > { %v2351_v0 = vadd.f32 %v2775_v49, %v2350_v55 }
 0x5bc   : > { %2371 = vst.msk [vmem:[%s399_s29 + $0x10] sm:$0xff] %vm2368_vm9, %v2351_v0 }
 0x5c1   : > { %v2353_v16 = vpop.f32.mrf.mxu1 }
 0x5c2   : > { %v2354_v18 = vadd.f32 %v2775_v49, %v2353_v16 }
 0x5c4   : > { %2372 = vst.msk [vmem:[%s399_s29 + $0x18] sm:$0xff] %vm2368_vm9, %v2354_v18 }
 0x5c9   : > { %v2356_v28 = vpop.f32.mrf.mxu1 }
 0x5ca   : > { %v2357_v26 = vadd.f32 %v2775_v49, %v2356_v28 }
 0x5cc   : > { %2373 = vst.msk [vmem:[%s399_s29 + $0x20] sm:$0xff] %vm2368_vm9, %v2357_v26 }
 0x5d1   : > { %v2359_v34 = vpop.f32.mrf.mxu1 }
 0x5d2   : > { %v2360_v44 = vadd.f32 %v2775_v49, %v2359_v34 }
 0x5d4   : > { %2374 = vst.msk [vmem:[%s399_s29 + $0x28] sm:$0xff] %vm2368_vm9, %v2360_v44 }
 0x5d9   : > { %v2362_v22 = vpop.f32.mrf.mxu1 }
 0x5da   : > { %v2363_v53 = vadd.f32 %v2775_v49, %v2362_v22 }
 0x5dc   : > { %2375 = vst.msk [vmem:[%s399_s29 + $0x30] sm:$0xff] %vm2368_vm9, %v2363_v53 }
 0x5e1   : > { %v2365_v30 = vpop.f32.mrf.mxu1 }
 0x5e2   : > { %v2366_v1 = vadd.f32 %v2775_v49, %v2365_v30 }
 0x5e4   : > { %2376 = vst.msk [vmem:[%s399_s29 + $0x38] sm:$0xff] %vm2368_vm9, %v2366_v1 }
 0x5e5 PF: > { %s22_s17 = sadd.s32 1, %s2786_s17  }
 0x5e6   : > { %p19_p4 = scmp.ge.s32.totalorder %s22_s17, 4  }
 0x5e8   :  { %21 = sbr.rel (!%p19_p4) target bundleno = 1 (0x1), region = 122 }

</bundles_post_ra>
